<compile_context>
chip_gen: v5e
topology: v5e:2x2
jax: 0.10.0
libtpu: 0.0.40
codegen_flags: <defaults>
</compile_context>

<pallas_src>
import jax
import jax.numpy as jnp
from jax import lax
from jax.experimental import pallas as pl
from jax.experimental.pallas import tpu as pltpu

IN_DIM = 784     # used as-is (no K padding)
HID_DIM = 400
Z_DIM = 20

HID_P = 512      # 4 * 128 (hidden padded to lane multiple)
HEAD_P = 128     # fused loc|scale head (2*Z_DIM = 40) padded to one full lane group

SUB = 256        # rows per in-kernel sub-tile of the batch tile


def _round_up(x, m):
    return (x + m - 1) // m * m


def encoder_kernel(x_ref, w1_ref, b1_ref, wh_ref, bh_ref, out_ref):
    """x_ref: [TB, 784] f32; w1: [784, 512] bf16; b1: [1, 512] f32;
    wh: [512, 128] f32 (fused loc|scale head); bh: [1, 128] f32; out: [TB, 128] bf16."""
    tb = x_ref.shape[0]

    def chunk(row0, rows):
        r0 = pl.multiple_of(row0, min(rows, SUB))
        xs = x_ref[pl.ds(r0, rows), :].astype(jnp.bfloat16)          # cast in-kernel
        # Layer 1 on the MXU: bf16 operands, f32 accumulation.
        h1 = jnp.dot(xs, w1_ref[...], preferred_element_type=jnp.float32)
        h1 = jnp.maximum(h1 + b1_ref[...], 0.0)                       # VPU, f32
        # Fused head (loc | scale | zero-pad): small matmul, keep f32 for accuracy.
        out = jnp.dot(h1, wh_ref[...], preferred_element_type=jnp.float32) + bh_ref[...]
        out_ref[pl.ds(r0, rows), :] = out.astype(out_ref.dtype)

    if tb <= SUB:
        chunk(0, tb)
    else:
        # tb is a multiple of SUB by construction of the batch tile.
        n_sub = tb // SUB

        def body(i, carry):
            chunk(i * SUB, SUB)
            return carry

        lax.fori_loop(0, n_sub, body, 0, unroll=True)


def _choose_tb(batch):
    if batch <= 256:
        # bf16 packs (16, 128) per vreg -> round tiny batches to 16 rows.
        return max(16, _round_up(batch, 16))
    # Target >= 4 grid steps (dual-TC sharding on v7x + pipelining); cap at 1024 so
    # double-buffered f32 x tiles fit v7x's 64 MiB VMEM (v5e/v6e could go larger).
    return min(1024, _round_up(pl.cdiv(batch, 4), 256))


def _vmem_limit_bytes(tb):
    x_tile = tb * IN_DIM * 4          # f32 input tile
    out_tile = tb * HEAD_P * 2        # bf16 output tile
    w1 = IN_DIM * HID_P * 2           # bf16 resident weight
    wh = HID_P * HEAD_P * 4           # f32 fused head weight
    biases = (HID_P + HEAD_P) * 4
    h1 = min(tb, SUB) * HID_P * 4     # f32 sub-tile intermediate
    need = 2 * (x_tile + out_tile) + 2 * (w1 + wh + biases) + 2 * h1
    return min(int(need) + (8 << 20), 56 << 20)   # headroom; stays under v7x's 64 MiB


@jax.jit
def encoder_forward(x, params):
    """x: [B, 784] f32. Returns (loc, scale), each [B, 20] f32."""
    w1, b1, wh, bh = params
    B = x.shape[0]

    TB = _choose_tb(B)
    Bp = _round_up(B, TB)
    if Bp != B:
        # Only the batch axis is padded (rows of zeros); no feature pad, no dtype pass.
        x = jnp.pad(x, ((0, Bp - B), (0, 0)))

    cost = pl.CostEstimate(
        flops=2 * Bp * (IN_DIM * HID_P + HID_P * HEAD_P),
        transcendentals=0,
        bytes_accessed=(Bp * IN_DIM * 4 + Bp * HEAD_P * 2
                        + IN_DIM * HID_P * 2 + HID_P * HEAD_P * 4),
    )

    # TODO(synk): mark the grid-invariant weight/bias specs pipeline_mode=pl.Buffered(1)
    # to drop their redundant double-buffers once that path is validated on all targets.
    out = pl.pallas_call(
        encoder_kernel,
        out_shape=jax.ShapeDtypeStruct((Bp, HEAD_P), jnp.bfloat16),
        grid_spec=pltpu.PrefetchScalarGridSpec(
            num_scalar_prefetch=0,
            grid=(Bp // TB,),
            in_specs=[
                pl.BlockSpec((TB, IN_DIM), lambda i: (i, 0)),     # x: tiled over batch (f32)
                pl.BlockSpec((IN_DIM, HID_P), lambda i: (0, 0)),  # W1: resident (bf16)
                pl.BlockSpec((1, HID_P), lambda i: (0, 0)),       # b1: resident (f32)
                pl.BlockSpec((HID_P, HEAD_P), lambda i: (0, 0)),  # fused head W: resident (f32)
                pl.BlockSpec((1, HEAD_P), lambda i: (0, 0)),      # fused head b: resident (f32)
            ],
            out_specs=pl.BlockSpec((TB, HEAD_P), lambda i: (i, 0)),
        ),
        compiler_params=pltpu.CompilerParams(
            dimension_semantics=("parallel",),       # shard batch tiles across TCs (v7x)
            vmem_limit_bytes=_vmem_limit_bytes(TB),
        ),
        cost_estimate=cost,
    )(x, w1, b1, wh, bh)

    loc = out[:B, :Z_DIM].astype(jnp.float32)
    scale = out[:B, Z_DIM:2 * Z_DIM].astype(jnp.float32)
    return loc, scale


def init_params(key):
    """Deterministic init mimicking PyTorch nn.Linear default (U[-1/sqrt(fan_in), +]).

    Returns UNPADDED f32 params stored [in, out] (transposed vs PyTorch's [out, in]).
    """
    def linear(key, fan_in, fan_out):
        kw, kb = jax.random.split(key)
        bound = 1.0 / jnp.sqrt(fan_in)
        w = jax.random.uniform(kw, (fan_in, fan_out), jnp.float32, -bound, bound)
        b = jax.random.uniform(kb, (1, fan_out), jnp.float32, -bound, bound)
        return w, b

    k1, k2, k3 = jax.random.split(key, 3)
    w1, b1 = linear(k1, IN_DIM, HID_DIM)
    w21, b21 = linear(k2, HID_DIM, Z_DIM)
    w22, b22 = linear(k3, HID_DIM, Z_DIM)
    return (w1, b1, w21, b21, w22, b22)


def prepare_params(raw):
    """Zero-pad to lane-aligned output dims, fuse the two heads, cast W1 to bf16."""
    w1, b1, w21, b21, w22, b22 = raw

    w1_p = jnp.zeros((IN_DIM, HID_P), jnp.float32).at[:, :HID_DIM].set(w1)
    b1_p = jnp.zeros((1, HID_P), jnp.float32).at[:, :HID_DIM].set(b1)

    wh = jnp.zeros((HID_P, HEAD_P), jnp.float32)
    wh = wh.at[:HID_DIM, :Z_DIM].set(w21)
    wh = wh.at[:HID_DIM, Z_DIM:2 * Z_DIM].set(w22)
    bh = jnp.zeros((1, HEAD_P), jnp.float32)
    bh = bh.at[:, :Z_DIM].set(b21)
    bh = bh.at[:, Z_DIM:2 * Z_DIM].set(b22)

    return (w1_p.astype(jnp.bfloat16), b1_p, wh, bh)


def encoder_ref(x, raw_params):
    """Pure-JAX f32 reference for correctness checking."""
    w1, b1, w21, b21, w22, b22 = raw_params
    h1 = jnp.maximum(x @ w1 + b1, 0.0)
    return h1 @ w21 + b21, h1 @ w22 + b22


if __name__ == "__main__":
    # TODO(synk): the reference 'scale' head has no positivity transform (matches the
    # original module's forward exactly); a full VAE would apply exp/softplus downstream.
    key = jax.random.PRNGKey(0)
    kx, kp = jax.random.split(key)

    B = 8  # small demo batch
    x = jax.random.normal(kx, (B, IN_DIM), jnp.float32)
    raw_params = init_params(kp)
    params = prepare_params(raw_params)

    loc, scale = encoder_forward(x, params)
    jax.block_until_ready((loc, scale))

    loc_ref, scale_ref = encoder_ref(x, raw_params)
    assert loc.shape == (B, Z_DIM) and scale.shape == (B, Z_DIM)
    # bf16 operands in the first matmul + bf16 output slab -> loose tolerance vs f32 ref.
    assert jnp.allclose(loc, loc_ref, atol=5e-2, rtol=5e-2), \
        float(jnp.max(jnp.abs(loc - loc_ref)))
    assert jnp.allclose(scale, scale_ref, atol=5e-2, rtol=5e-2), \
        float(jnp.max(jnp.abs(scale - scale_ref)))

    print("KERNEL_OK")
</pallas_src>

<mosaic_0001>
module attributes {stable_mosaic.version = 11 : i64} {
  func.func @encoder_kernel(%arg0: i32, %arg1: memref<16x784xf32, #tpu.memory_space<vmem>>, %arg2: memref<784x512xbf16, #tpu.memory_space<vmem>>, %arg3: memref<1x512xf32, #tpu.memory_space<vmem>>, %arg4: memref<512x128xf32, #tpu.memory_space<vmem>>, %arg5: memref<1x128xf32, #tpu.memory_space<vmem>>, %arg6: memref<16x128xbf16, #tpu.memory_space<vmem>>) attributes {dimension_semantics = [#tpu.dimension_semantics<parallel>], iteration_bounds = array<i64: 1>, scalar_prefetch = 0 : i64, scratch_operands = 0 : i64, tpu.core_type = #tpu.core_type<tc>, window_params = [{transform_indices = @transform_0, window_bounds = array<i64: 16, 784>}, {pipeline_mode = #tpu.pipeline_mode<synchronous>, transform_indices = @transform_1, window_bounds = array<i64: 784, 512>}, {pipeline_mode = #tpu.pipeline_mode<synchronous>, transform_indices = @transform_2, window_bounds = array<i64: 1, 512>}, {pipeline_mode = #tpu.pipeline_mode<synchronous>, transform_indices = @transform_3, window_bounds = array<i64: 512, 128>}, {pipeline_mode = #tpu.pipeline_mode<synchronous>, transform_indices = @transform_4, window_bounds = array<i64: 1, 128>}, {transform_indices = @transform_5, window_bounds = array<i64: 16, 128>}]} {
    %c0_i32 = arith.constant 0 : i32
    %0 = tpu.assume_multiple %c0_i32, 16 : i32
    %1 = arith.index_cast %0 : i32 to index
    %c0 = arith.constant 0 : index
    %2 = vector.load %arg1[%1, %c0] : memref<16x784xf32, #tpu.memory_space<vmem>>, vector<16x784xf32>
    %3 = arith.truncf %2 : vector<16x784xf32> to vector<16x784xbf16>
    %c0_0 = arith.constant 0 : index
    %c0_1 = arith.constant 0 : index
    %4 = vector.load %arg2[%c0_0, %c0_1] : memref<784x512xbf16, #tpu.memory_space<vmem>>, vector<784x512xbf16>
    %cst = arith.constant dense<0.000000e+00> : vector<16x512xf32>
    %5 = tpu.matmul %3, %4, %cst {dimension_numbers = #tpu.dot_dimension_numbers<[1], [0], [0], [1], [0, 0, 1, 1], [], []>} : vector<16x784xbf16>, vector<784x512xbf16>, vector<16x512xf32> -> vector<16x512xf32>
    %c0_2 = arith.constant 0 : index
    %c0_3 = arith.constant 0 : index
    %6 = vector.load %arg3[%c0_2, %c0_3] : memref<1x512xf32, #tpu.memory_space<vmem>>, vector<1x512xf32>
    %7 = vector.broadcast %6 : vector<1x512xf32> to vector<16x512xf32>
    %8 = arith.addf %5, %7 : vector<16x512xf32>
    %cst_4 = arith.constant 0.000000e+00 : f32
    %9 = vector.broadcast %cst_4 : f32 to vector<16x512xf32>
    %10 = arith.maximumf %8, %9 : vector<16x512xf32>
    %c0_5 = arith.constant 0 : index
    %c0_6 = arith.constant 0 : index
    %11 = vector.load %arg4[%c0_5, %c0_6] : memref<512x128xf32, #tpu.memory_space<vmem>>, vector<512x128xf32>
    %cst_7 = arith.constant dense<0.000000e+00> : vector<16x128xf32>
    %12 = tpu.matmul %10, %11, %cst_7 {dimension_numbers = #tpu.dot_dimension_numbers<[1], [0], [0], [1], [0, 0, 1, 1], [], []>} : vector<16x512xf32>, vector<512x128xf32>, vector<16x128xf32> -> vector<16x128xf32>
    %c0_8 = arith.constant 0 : index
    %c0_9 = arith.constant 0 : index
    %13 = vector.load %arg5[%c0_8, %c0_9] : memref<1x128xf32, #tpu.memory_space<vmem>>, vector<1x128xf32>
    %14 = vector.broadcast %13 : vector<1x128xf32> to vector<16x128xf32>
    %15 = arith.addf %12, %14 : vector<16x128xf32>
    %16 = arith.truncf %15 : vector<16x128xf32> to vector<16x128xbf16>
    %17 = arith.index_cast %0 : i32 to index
    %c0_10 = arith.constant 0 : index
    %18 = vector.load %arg6[%17, %c0_10] : memref<16x128xbf16, #tpu.memory_space<vmem>>, vector<16x128xbf16>
    tpu.vector_store %arg6[%17, %c0_10], %16 {strides = array<i32>} : memref<16x128xbf16, #tpu.memory_space<vmem>>, vector<16x128xbf16>,
    return
  }
  func.func @transform_0(%arg0: i32) -> (i32, i32) {
    %c0_i32 = arith.constant 0 : i32
    %c0_i32_0 = arith.constant 0 : i32
    return %arg0, %c0_i32 : i32, i32
  }
  func.func @transform_1(%arg0: i32) -> (i32, i32) {
    %c0_i32 = arith.constant 0 : i32
    %c0_i32_0 = arith.constant 0 : i32
    %c0_i32_1 = arith.constant 0 : i32
    return %c0_i32, %c0_i32_0 : i32, i32
  }
  func.func @transform_2(%arg0: i32) -> (i32, i32) {
    %c0_i32 = arith.constant 0 : i32
    %c0_i32_0 = arith.constant 0 : i32
    %c0_i32_1 = arith.constant 0 : i32
    return %c0_i32, %c0_i32_0 : i32, i32
  }
  func.func @transform_3(%arg0: i32) -> (i32, i32) {
    %c0_i32 = arith.constant 0 : i32
    %c0_i32_0 = arith.constant 0 : i32
    %c0_i32_1 = arith.constant 0 : i32
    return %c0_i32, %c0_i32_0 : i32, i32
  }
  func.func @transform_4(%arg0: i32) -> (i32, i32) {
    %c0_i32 = arith.constant 0 : i32
    %c0_i32_0 = arith.constant 0 : i32
    %c0_i32_1 = arith.constant 0 : i32
    return %c0_i32, %c0_i32_0 : i32, i32
  }
  func.func @transform_5(%arg0: i32) -> (i32, i32) {
    %c0_i32 = arith.constant 0 : i32
    %c0_i32_0 = arith.constant 0 : i32
    return %arg0, %c0_i32 : i32, i32
  }
}

</mosaic_0001>

<bundles_post_ra>
// kernel: encoder_forward.1
= control target key start
LH: loop header
LB: loop body
LE: loop exit
PB: predicated region body
PF: predicated region fallthrough
CT: control target
= control target key end

     0   :  { %10 = vsyncpa [#allocation3], 0  ;;  %s3030_s0 = inlined_call_operand.vmem [shape: f32[16,784], index: 0, kind: input, shape index: {}]   ;;  %s3031_s1 = inlined_call_operand.hbm [shape: bf16[784,512], index: 1, kind: input, shape index: {}]   ;;  %s3032_s2 = inlined_call_operand.vmem [shape: f32[1,512], index: 2, kind: input, shape index: {}]   ;;  %s3033_s3 = inlined_call_operand.hbm [shape: f32[512,128], index: 3, kind: input, shape index: {}]   ;;  %s3034_s4 = inlined_call_operand.vmem [shape: f32[1,128], index: 4, kind: input, shape index: {}]   ;;  %s3035_s5 = inlined_call_operand.vmem [shape: bf16[16,128], index: 5, kind: output, shape index: {}]  }
   0x1   :  { %s18_s20 = sshll.u32 %s3031_s1, 4  ;;  %s19_s20 = int_to_ptr.hbm [resolvable:$true] %s18_s20 }
   0x2   :  { %11 = vsyncpa [#allocation5], 0  ;;  %s2885_s21 = smov [#allocation2]   ;;  %s33_s25 = sshll.u32 %s3033_s3, 4  ;;  %s34_s25 = int_to_ptr.hbm [resolvable:$true] %s33_s25 }
   0x3   :  { %s20_s22 = sshll.u32 %s2885_s21, 4  ;;  %s2886_s26 = smov 256   ;;  %s21_s22 = int_to_ptr.vmem [resolvable:$true] %s20_s22 }
   0x4   :  { %s2887_s27 = smov 16   ;;  %s2888_s28 = smov [#allocation4]  }
   0x5   :  { %26 = dma.hbm_to_vmem [thread:$0]  %s19_s20, 25088, %s21_s22, [#allocation3], %s2886_s26, %s2886_s26, %s2887_s27  }
   0x6   :  { %s35_s29 = sshll.u32 %s2888_s28, 4  ;;  %s2889_s30 = smov 128   ;;  %s36_s29 = int_to_ptr.vmem [resolvable:$true] %s35_s29 }
   0x7   :  { %s2890_s6 = smov 8  }
   0x8   :  { %41 = dma.hbm_to_vmem [thread:$0]  %s34_s25, 8192, %s36_s29, [#allocation5], %s2889_s30, %s2889_s30, %s2890_s6  }
   0x9   :  { %2881 = dma.done.wait [#allocation3], 25088  }
   0xa   :  { %2882 = vsyncadd [#allocation3], 4294942208 }
   0xb   :  { %2883 = dma.done.wait [#allocation5], 8192  }
   0xc   :  { %2884 = vsyncadd [#allocation5], 4294959104  ;;  %v1951_v0 = vld [vmem:[#allocation2 + $0xe0] sm:$0xf]  ;;  %v2655_v1 = vld [vmem:[#allocation2 + $0xec] sm:$0xf0] }
   0xd   :  { %v2079_v2 = vld [vmem:[#allocation2 + $0x1e0] sm:$0xf]  ;;  %v1952_v3 = vor.u32 %v2655_v1, %v1951_v0  ;;  %v2687_v4 = vld [vmem:[#allocation2 + $0x1ec] sm:$0xf0]  ;;  %vm1263_vm0 = vcmask 130048  }
   0xe   :  { %v2207_v5 = vld [vmem:[#allocation2 + $0x2e0] sm:$0xf]  ;;  %v2719_v6 = vld [vmem:[#allocation2 + $0x2ec] sm:$0xf0]  ;;  %v2080_v7 = vor.u32 %v2687_v4, %v2079_v2 }
   0xf   :  { %v2208_v8 = vor.u32 %v2719_v6, %v2207_v5  ;;  %v2335_v9 = vld [vmem:[#allocation2 + $0x3e0] sm:$0xf]  ;;  %v2751_v10 = vld [vmem:[#allocation2 + $0x3ec] sm:$0xf0]  ;;  %1267 = vmatpush.bf16.msra.mxu0 %v1952_v3 }
  0x10   :  { %v1935_v11 = vld [vmem:[#allocation2 + $0xc0] sm:$0xf]  ;;  %v2336_v12 = vor.u32 %v2751_v10, %v2335_v9  ;;  %v2651_v13 = vld [vmem:[#allocation2 + $0xcc] sm:$0xf0]  ;;  %1281 = vmatpush.bf16.msra.mxu1 %v2080_v7 }
  0x11   :  { %v2063_v14 = vld [vmem:[#allocation2 + $0x1c0] sm:$0xf]  ;;  %v2683_v15 = vld [vmem:[#allocation2 + $0x1cc] sm:$0xf0]  ;;  %1295 = vmatpush.bf16.msra.mxu2 %v2208_v8  ;;  %v1936_v16 = vor.u32 %v2651_v13, %v1935_v11 }
  0x12   :  { %v2064_v17 = vor.u32 %v2683_v15, %v2063_v14  ;;  %v2191_v18 = vld [vmem:[#allocation2 + $0x2c0] sm:$0xf]  ;;  %v2715_v19 = vld [vmem:[#allocation2 + $0x2cc] sm:$0xf0]  ;;  %1309 = vmatpush.bf16.msra.mxu3 %v2336_v12 }
  0x13   :  { %v2319_v20 = vld [vmem:[#allocation2 + $0x3c0] sm:$0xf]  ;;  %v2192_v21 = vor.u32 %v2715_v19, %v2191_v18  ;;  %v2747_v22 = vld [vmem:[#allocation2 + $0x3cc] sm:$0xf0]  ;;  %1268 = vmatpush.bf16.msra.mxu0 %v1936_v16 }
  0x14   :  { %v1919_v23 = vld [vmem:[#allocation2 + $0xa0] sm:$0xf]  ;;  %v2647_v24 = vld [vmem:[#allocation2 + $0xac] sm:$0xf0]  ;;  %v2320_v25 = vor.u32 %v2747_v22, %v2319_v20  ;;  %1282 = vmatpush.bf16.msra.mxu1 %v2064_v17 }
  0x15   :  { %v2047_v26 = vld [vmem:[#allocation2 + $0x1a0] sm:$0xf]  ;;  %v2679_v27 = vld [vmem:[#allocation2 + $0x1ac] sm:$0xf0]  ;;  %v1920_v29 = vor.u32 %v2647_v24, %v1919_v23  ;;  %1296 = vmatpush.bf16.msra.mxu2 %v2192_v21 }
  0x16   :  { %v2175_v28 = vld [vmem:[#allocation2 + $0x2a0] sm:$0xf]  ;;  %v2711_v30 = vld [vmem:[#allocation2 + $0x2ac] sm:$0xf0]  ;;  %v2048_v33 = vor.u32 %v2679_v27, %v2047_v26  ;;  %1310 = vmatpush.bf16.msra.mxu3 %v2320_v25 }
  0x17   :  { %v2303_v31 = vld [vmem:[#allocation2 + $0x3a0] sm:$0xf]  ;;  %v2743_v32 = vld [vmem:[#allocation2 + $0x3ac] sm:$0xf0]  ;;  %v2176_v34 = vor.u32 %v2711_v30, %v2175_v28  ;;  %1269 = vmatpush.bf16.msra.mxu0 %v1920_v29 }
  0x18   :  { %v1903_v35 = vld [vmem:[#allocation2 + $0x80] sm:$0xf]  ;;  %v2643_v36 = vld [vmem:[#allocation2 + $0x8c] sm:$0xf0]  ;;  %v2304_v38 = vor.u32 %v2743_v32, %v2303_v31  ;;  %1283 = vmatpush.bf16.msra.mxu1 %v2048_v33  ;;  %v2653_v32 = vld [vmem:[#allocation2 + $0xe4] sm:$0xf] }
  0x19   :  { %v2031_v37 = vld [vmem:[#allocation2 + $0x180] sm:$0xf]  ;;  %v2675_v39 = vld [vmem:[#allocation2 + $0x18c] sm:$0xf0]  ;;  %v1904_v44 = vor.u32 %v2643_v36, %v1903_v35  ;;  %1297 = vmatpush.bf16.msra.mxu2 %v2176_v34  ;;  %v1953_v33 = vld [vmem:[#allocation2 + $0xf0] sm:$0xf0] }
  0x1a   :  { %v2159_v40 = vld [vmem:[#allocation2 + $0x280] sm:$0xf]  ;;  %v2707_v41 = vld [vmem:[#allocation2 + $0x28c] sm:$0xf0]  ;;  %v2032_v45 = vor.u32 %v2675_v39, %v2031_v37  ;;  %1311 = vmatpush.bf16.msra.mxu3 %v2304_v38  ;;  %v65_v36 = vld [vmem:[%s3030_s0 + $0x48] sm:$0xff] }
  0x1b   :  { %v2287_v42 = vld [vmem:[#allocation2 + $0x380] sm:$0xf]  ;;  %v2739_v43 = vld [vmem:[#allocation2 + $0x38c] sm:$0xf0]  ;;  %v2160_v46 = vor.u32 %v2707_v41, %v2159_v40  ;;  %1270 = vmatpush.bf16.msra.mxu0 %v1904_v44  ;;  %v2685_v41 = vld [vmem:[#allocation2 + $0x1e4] sm:$0xf] }
  0x1c   :  { %v1887_v47 = vld [vmem:[#allocation2 + $0x60] sm:$0xf]  ;;  %v2639_v48 = vld [vmem:[#allocation2 + $0x6c] sm:$0xf0]  ;;  %v2288_v50 = vor.u32 %v2739_v43, %v2287_v42  ;;  %1284 = vmatpush.bf16.msra.mxu1 %v2032_v45  ;;  %v63_v43 = vld [vmem:[%s3030_s0 + $0x38] sm:$0xff] }
  0x1d   :  { %v2015_v49 = vld [vmem:[#allocation2 + $0x160] sm:$0xf]  ;;  %v2671_v51 = vld [vmem:[#allocation2 + $0x16c] sm:$0xf0]  ;;  %v1888_v56 = vor.u32 %v2639_v48, %v1887_v47  ;;  %1298 = vmatpush.bf16.msra.mxu2 %v2160_v46  ;;  %v2081_v46 = vld [vmem:[#allocation2 + $0x1f0] sm:$0xf0] }
  0x1e   :  { %v2143_v52 = vld [vmem:[#allocation2 + $0x260] sm:$0xf]  ;;  %v2703_v53 = vld [vmem:[#allocation2 + $0x26c] sm:$0xf0]  ;;  %v2016_v57 = vor.u32 %v2671_v51, %v2015_v49  ;;  %1312 = vmatpush.bf16.msra.mxu3 %v2288_v50  ;;  %v59_v47 = vld [vmem:[%s3030_s0 + $0x18] sm:$0xff]  ;;  %v1956_v50 = vor.u32 %v2653_v32, %v1953_v33 }
  0x1f   :  { %v2271_v54 = vld [vmem:[#allocation2 + $0x360] sm:$0xf]  ;;  %v2735_v55 = vld [vmem:[#allocation2 + $0x36c] sm:$0xf0]  ;;  %v2144_v58 = vor.u32 %v2703_v53, %v2143_v52  ;;  %1271 = vmatpush.bf16.msra.mxu0 %v1888_v56 }
  0x20   :  { %v1871_v59 = vld [vmem:[#allocation2 + $0x40] sm:$0xf]  ;;  %v2635_v60 = vld [vmem:[#allocation2 + $0x4c] sm:$0xf0]  ;;  %v2272_v62 = vor.u32 %v2735_v55, %v2271_v54  ;;  %1285 = vmatpush.bf16.msra.mxu1 %v2016_v57  ;;  %v2649_v57 = vld [vmem:[#allocation2 + $0xc4] sm:$0xf] }
  0x21   :  { %v1999_v61 = vld [vmem:[#allocation2 + $0x140] sm:$0xf]  ;;  %v2667_v63 = vld [vmem:[#allocation2 + $0x14c] sm:$0xf0]  ;;  %v1872_v4 = vor.u32 %v2635_v60, %v1871_v59  ;;  %1299 = vmatpush.bf16.msra.mxu2 %v2144_v58  ;;  %v1937_v58 = vld [vmem:[#allocation2 + $0xd0] sm:$0xf0] }
  0x22   :  { %v2127_v0 = vld [vmem:[#allocation2 + $0x240] sm:$0xf]  ;;  %v2699_v1 = vld [vmem:[#allocation2 + $0x24c] sm:$0xf0]  ;;  %v2000_v6 = vor.u32 %v2667_v63, %v1999_v61  ;;  %1313 = vmatpush.bf16.msra.mxu3 %v2272_v62  ;;  %v57_v61 = vld [vmem:[%s3030_s0 + $0x8] sm:$0xff]  ;;  %v2084_v63 = vor.u32 %v2685_v41, %v2081_v46 }
  0x23   :  { %v2255_v2 = vld [vmem:[#allocation2 + $0x340] sm:$0xf]  ;;  %v2731_v3 = vld [vmem:[#allocation2 + $0x34c] sm:$0xf0]  ;;  %v2128_v7 = vor.u32 %v2699_v1, %v2127_v0  ;;  %1272 = vmatpush.bf16.msra.mxu0 %v1872_v4  ;;  %v2681_v1 = vld [vmem:[#allocation2 + $0x1c4] sm:$0xf]  ;;  %v1940_v4 = vor.u32 %v2649_v57, %v1937_v58 }
  0x24   :  { %v1855_v5 = vld [vmem:[#allocation2 + $0x20] sm:$0xf]  ;;  %v2631_v8 = vld [vmem:[#allocation2 + $0x2c] sm:$0xf0]  ;;  %v2256_v11 = vor.u32 %v2731_v3, %v2255_v2  ;;  %1286 = vmatpush.bf16.msra.mxu1 %v2000_v6  ;;  %v2065_v2 = vld [vmem:[#allocation2 + $0x1d0] sm:$0xf0] }
  0x25   :  { %v1983_v9 = vld [vmem:[#allocation2 + $0x120] sm:$0xf]  ;;  %v2663_v10 = vld [vmem:[#allocation2 + $0x12c] sm:$0xf0]  ;;  %v1856_v18 = vor.u32 %v2631_v8, %v1855_v5  ;;  %1300 = vmatpush.bf16.msra.mxu2 %v2128_v7  ;;  %v2017_v41 = vld [vmem:[#allocation2 + $0x170] sm:$0xf0] }
  0x26   :  { %v2111_v12 = vld [vmem:[#allocation2 + $0x220] sm:$0xf]  ;;  %v2695_v13 = vld [vmem:[#allocation2 + $0x22c] sm:$0xf0]  ;;  %v1984_v23 = vor.u32 %v2663_v10, %v1983_v9  ;;  %1314 = vmatpush.bf16.msra.mxu3 %v2256_v11  ;;  %v2645_v10 = vld [vmem:[#allocation2 + $0xa4] sm:$0xf] }
  0x27   :  { %v2239_v14 = vld [vmem:[#allocation2 + $0x320] sm:$0xf]  ;;  %v2727_v15 = vld [vmem:[#allocation2 + $0x32c] sm:$0xf0]  ;;  %v2112_v24 = vor.u32 %v2695_v13, %v2111_v12  ;;  %1273 = vmatpush.bf16.msra.mxu0 %v1856_v18  ;;  %v1921_v11 = vld [vmem:[#allocation2 + $0xb0] sm:$0xf0]  ;;  %v2068_v12 = vor.u32 %v2681_v1, %v2065_v2 }
  0x28   :  { %v1839_v16 = vld [vmem:[#allocation2] sm:$0xf]  ;;  %v2627_v17 = vld [vmem:[#allocation2 + $0xc] sm:$0xf0]  ;;  %v2240_v28 = vor.u32 %v2727_v15, %v2239_v14  ;;  %1287 = vmatpush.bf16.msra.mxu1 %v1984_v23  ;;  %v2677_v14 = vld [vmem:[#allocation2 + $0x1a4] sm:$0xf] }
  0x29   :  { %v1967_v19 = vld [vmem:[#allocation2 + $0x100] sm:$0xf]  ;;  %v2659_v20 = vld [vmem:[#allocation2 + $0x10c] sm:$0xf0]  ;;  %v1840_v35 = vor.u32 %v2627_v17, %v1839_v16  ;;  %1301 = vmatpush.bf16.msra.mxu2 %v2112_v24  ;;  %v2049_v15 = vld [vmem:[#allocation2 + $0x1b0] sm:$0xf0]  ;;  %v1924_v17 = vor.u32 %v2645_v10, %v1921_v11 }
  0x2a   :  { %v2095_v21 = vld [vmem:[#allocation2 + $0x200] sm:$0xf]  ;;  %v2691_v22 = vld [vmem:[#allocation2 + $0x20c] sm:$0xf0]  ;;  %v1968_v39 = vor.u32 %v2659_v20, %v1967_v19  ;;  %1315 = vmatpush.bf16.msra.mxu3 %v2240_v28  ;;  %v1905_v23 = vld [vmem:[#allocation2 + $0x90] sm:$0xf0]  ;;  %v2052_v24 = vor.u32 %v2677_v14, %v2049_v15 }
  0x2b   :  { %v2223_v25 = vld [vmem:[#allocation2 + $0x300] sm:$0xf]  ;;  %v2723_v26 = vld [vmem:[#allocation2 + $0x30c] sm:$0xf0]  ;;  %v2096_v40 = vor.u32 %v2691_v22, %v2095_v21  ;;  %1274 = vmatpush.bf16.msra.mxu0 %v1840_v35  ;;  %v2641_v22 = vld [vmem:[#allocation2 + $0x84] sm:$0xf] }
  0x2c   :  { %v2463_v27 = vld [vmem:[#allocation2 + $0x4e0] sm:$0xf]  ;;  %v2783_v29 = vld [vmem:[#allocation2 + $0x4ec] sm:$0xf0]  ;;  %v2224_v44 = vor.u32 %v2723_v26, %v2223_v25  ;;  %1288 = vmatpush.bf16.msra.mxu1 %v1968_v39  ;;  %v2673_v26 = vld [vmem:[#allocation2 + $0x184] sm:$0xf] }
  0x2d   :  { %v2591_v30 = vld [vmem:[#allocation2 + $0x5e0] sm:$0xf]  ;;  %v2815_v31 = vld [vmem:[#allocation2 + $0x5ec] sm:$0xf0]  ;;  %v2464_v45 = vor.u32 %v2783_v29, %v2463_v27  ;;  %1302 = vmatpush.bf16.msra.mxu2 %v2096_v40  ;;  %v2033_v27 = vld [vmem:[#allocation2 + $0x190] sm:$0xf0]  ;;  %v1908_v29 = vor.u32 %v2641_v22, %v1905_v23 }
  0x2e   :  { %v58_v34 = vld [vmem:[%s3030_s0 + $0x10] sm:$0xff]  ;;  %v2607_v37 = vld [vmem:[#allocation2 + $0x600] sm:$0xf]  ;;  %v2592_v49 = vor.u32 %v2815_v31, %v2591_v30  ;;  %1316 = vmatpush.bf16.msra.mxu3 %v2224_v44  ;;  %v2669_v40 = vld [vmem:[#allocation2 + $0x164] sm:$0xf] }
  0x2f   :  { %v2819_v38 = vld [vmem:[#allocation2 + $0x60c] sm:$0xf0]  ;;  %v56_v42 = vld [vmem:[%s3030_s0] sm:$0xff]  ;;  %v2945_v54 = vpack.c.bf16 %v65_v36, %v58_v34  ;;  %1323 = vmatpush.bf16.msrb.mxu0 %v2464_v45  ;;  %v1889_v35 = vld [vmem:[#allocation2 + $0x70] sm:$0xf0] }
  0x30   :  { %v66_v48 = vld [vmem:[%s3030_s0 + $0x50] sm:$0xff]  ;;  %v2447_v51 = vld [vmem:[#allocation2 + $0x4c0] sm:$0xf]  ;;  %v2947_v55 = vpack.c.bf16 %v63_v43, %v56_v42  ;;  %v2608_v59 = vor.u32 %v2819_v38, %v2607_v37  ;;  %1337 = vmatpush.bf16.msrb.mxu1 %v2592_v49  ;;  %v2637_v34 = vld [vmem:[#allocation2 + $0x64] sm:$0xf]  ;;  %v2036_v38 = vor.u32 %v2673_v26, %v2033_v27 }
  0x31   :  { %v2779_v52 = vld [vmem:[#allocation2 + $0x4cc] sm:$0xf0]  ;;  %v2575_v53 = vld [vmem:[#allocation2 + $0x5c0] sm:$0xf]  ;;  %v2949_v60 = vpack.c.bf16 %v66_v48, %v59_v47  ;;  %1303 = vmatmul.bf16.vlgmr.msra.gmra.mxu2 %v2945_v54  ;;  %v69_v37 = vld [vmem:[%s3030_s0 + $0x68] sm:$0xff]  ;;  %v1892_v43 = vor.u32 %v2637_v34, %v1889_v35 }
  0x32   :  { %v2811_v56 = vld [vmem:[#allocation2 + $0x5cc] sm:$0xf0]  ;;  %v64_v62 = vld [vmem:[%s3030_s0 + $0x40] sm:$0xff]  ;;  %v2448_v0 = vor.u32 %v2779_v52, %v2447_v51  ;;  %1365 = vmatpush.bf16.msrb.mxu3 %v1956_v50  ;;  %1275 = vmatmul.bf16.vlgmr.msra.gmra.mxu0 %v2947_v55  ;;  %v1873_v49 = vld [vmem:[#allocation2 + $0x50] sm:$0xf0]  ;;  %v2020_v51 = vor.u32 %v2669_v40, %v2017_v41 }
  0x33   :  { %v2576_v3 = vor.u32 %v2811_v56, %v2575_v53  ;;  %v2431_v5 = vld [vmem:[#allocation2 + $0x4a0] sm:$0xf]  ;;  %v2775_v6 = vld [vmem:[#allocation2 + $0x4ac] sm:$0xf0]  ;;  %v2959_v8 = vpack.c.bf16 %v64_v62, %v57_v61  ;;  %1358 = vmatpush.bf16.msrb.mxu2 %v2608_v59  ;;  %1317 = vmatmul.bf16.vlgmr.msra.gmra.mxu3 %v2949_v60  ;;  %v2633_v48 = vld [vmem:[#allocation2 + $0x44] sm:$0xf] }
  0x34   :  { %v2559_v7 = vld [vmem:[#allocation2 + $0x5a0] sm:$0xf]  ;;  %v2807_v9 = vld [vmem:[#allocation2 + $0x5ac] sm:$0xf0]  ;;  %1324 = vmatpush.bf16.msrb.mxu0 %v2448_v0  ;;  %v2432_v13 = vor.u32 %v2775_v6, %v2431_v5  ;;  %v2665_v53 = vld [vmem:[#allocation2 + $0x144] sm:$0xf]  ;;  %v1876_v58 = vor.u32 %v2633_v48, %v1873_v49 }
  0x35   :  { %1338 = vmatpush.bf16.msrb.mxu1 %v2576_v3  ;;  %v2560_v16 = vor.u32 %v2807_v9, %v2559_v7  ;;  %v2415_v18 = vld [vmem:[#allocation2 + $0x480] sm:$0xf]  ;;  %v2771_v19 = vld [vmem:[#allocation2 + $0x48c] sm:$0xf0]  ;;  %v2001_v56 = vld [vmem:[#allocation2 + $0x150] sm:$0xf0] }
  0x36   :  { %1366 = vmatpush.bf16.msrb.mxu3 %v1940_v4  ;;  %v2543_v20 = vld [vmem:[#allocation2 + $0x580] sm:$0xf]  ;;  %1289 = vmatmul.bf16.vlgmr.msra.gmra.mxu1 %v2959_v8  ;;  %v2803_v21 = vld [vmem:[#allocation2 + $0x58c] sm:$0xf0]  ;;  %v2416_v25 = vor.u32 %v2771_v19, %v2415_v18  ;;  %v2629_v0 = vld [vmem:[#allocation2 + $0x24] sm:$0xf]  ;;  %v2004_v4 = vor.u32 %v2665_v53, %v2001_v56 }
  0x37   :  { %1379 = vmatpush.bf16.msra.mxu2 %v2084_v63  ;;  %v2544_v28 = vor.u32 %v2803_v21, %v2543_v20  ;;  %v2399_v30 = vld [vmem:[#allocation2 + $0x460] sm:$0xf]  ;;  %v2767_v31 = vld [vmem:[#allocation2 + $0x46c] sm:$0xf0]  ;;  %v1857_v1 = vld [vmem:[#allocation2 + $0x30] sm:$0xf0] }
  0x38   :  { %1325 = vmatpush.bf16.msrb.mxu0 %v2432_v13  ;;  %v2527_v32 = vld [vmem:[#allocation2 + $0x560] sm:$0xf]  ;;  %v2799_v33 = vld [vmem:[#allocation2 + $0x56c] sm:$0xf0]  ;;  %v2400_v39 = vor.u32 %v2767_v31, %v2399_v30  ;;  %v2661_v2 = vld [vmem:[#allocation2 + $0x124] sm:$0xf]  ;;  %v1860_v11 = vor.u32 %v2629_v0, %v1857_v1 }
  0x39   :  { %1339 = vmatpush.bf16.msrb.mxu1 %v2560_v16  ;;  %v62_v36 = vld [vmem:[%s3030_s0 + $0x30] sm:$0xff]  ;;  %v2528_v42 = vor.u32 %v2799_v33, %v2527_v32  ;;  %v2383_v44 = vld [vmem:[#allocation2 + $0x440] sm:$0xf]  ;;  %v2625_v13 = vld [vmem:[#allocation2 + $0x4] sm:$0xf] }
  0x3a   :  { %1367 = vmatpush.bf16.msrb.mxu3 %v1924_v17  ;;  %v2763_v45 = vld [vmem:[#allocation2 + $0x44c] sm:$0xf0]  ;;  %v2511_v46 = vld [vmem:[#allocation2 + $0x540] sm:$0xf]  ;;  %v2969_v50 = vpack.c.bf16 %v69_v37, %v62_v36  ;;  %v1985_v3 = vld [vmem:[#allocation2 + $0x130] sm:$0xf0] }
  0x3b   :  { %1380 = vmatpush.bf16.msra.mxu2 %v2068_v12  ;;  %v2795_v47 = vld [vmem:[#allocation2 + $0x54c] sm:$0xf0]  ;;  %v2384_v52 = vor.u32 %v2763_v45, %v2383_v44  ;;  %v2367_v59 = vld [vmem:[#allocation2 + $0x420] sm:$0xf]  ;;  %v1841_v14 = vld [vmem:[#allocation2 + $0x10] sm:$0xf0]  ;;  %v1988_v21 = vor.u32 %v2661_v2, %v1985_v3 }
  0x3c   :  { %1326 = vmatpush.bf16.msrb.mxu0 %v2416_v25  ;;  %v2512_v57 = vor.u32 %v2795_v47, %v2511_v46  ;;  %v2759_v61 = vld [vmem:[#allocation2 + $0x42c] sm:$0xf0]  ;;  %v2495_v62 = vld [vmem:[#allocation2 + $0x520] sm:$0xf]  ;;  %v2717_v15 = vld [vmem:[#allocation2 + $0x2e4] sm:$0xf]  ;;  %v1844_v27 = vor.u32 %v2625_v13, %v1841_v14 }
  0x3d   :  { %1340 = vmatpush.bf16.msrb.mxu1 %v2544_v28  ;;  %v2791_v63 = vld [vmem:[#allocation2 + $0x52c] sm:$0xf0]  ;;  %v2368_v5 = vor.u32 %v2759_v61, %v2367_v59  ;;  %v2351_v6 = vld [vmem:[#allocation2 + $0x400] sm:$0xf]  ;;  %v2209_v16 = vld [vmem:[#allocation2 + $0x2f0] sm:$0xf0] }
  0x3e   :  { %1368 = vmatpush.bf16.msrb.mxu3 %v1908_v29  ;;  %v2755_v7 = vld [vmem:[#allocation2 + $0x40c] sm:$0xf0]  ;;  %v2479_v9 = vld [vmem:[#allocation2 + $0x500] sm:$0xf]  ;;  %v2496_v10 = vor.u32 %v2791_v63, %v2495_v62  ;;  %v2749_v17 = vld [vmem:[#allocation2 + $0x3e4] sm:$0xf]  ;;  %v2212_v31 = vor.u32 %v2717_v15, %v2209_v16 }
  0x3f   :  { %1381 = vmatpush.bf16.msra.mxu2 %v2052_v24  ;;  %v2787_v12 = vld [vmem:[#allocation2 + $0x50c] sm:$0xf0]  ;;  %v2337_v18 = vld [vmem:[#allocation2 + $0x3f0] sm:$0xf0]  ;;  %v2781_v19 = vld [vmem:[#allocation2 + $0x4e4] sm:$0xf]  ;;  %v2352_v22 = vor.u32 %v2755_v7, %v2351_v6 }
  0x40   :  { %1327 = vmatpush.bf16.msrb.mxu0 %v2400_v39  ;;  %v2465_v20 = vld [vmem:[#allocation2 + $0x4f0] sm:$0xf0]  ;;  %v60_v23 = vld [vmem:[%s3030_s0 + $0x20] sm:$0xff]  ;;  %v67_v24 = vld [vmem:[%s3030_s0 + $0x58] sm:$0xff]  ;;  %v2480_v26 = vor.u32 %v2787_v12, %v2479_v9  ;;  %v2340_v32 = vor.u32 %v2749_v17, %v2337_v18 }
  0x41   :  { %1341 = vmatpush.bf16.msrb.mxu1 %v2528_v42  ;;  %2621 = vmatmul.msk.bf16.vlgmr.msrb.gmra.mxu2 %vm1263_vm0, %v2969_v50  ;;  %v2657_v25 = vld [vmem:[#allocation2 + $0x104] sm:$0xf]  ;;  %v1969_v28 = vld [vmem:[#allocation2 + $0x110] sm:$0xf0]  ;;  %v61_v29 = vld [vmem:[%s3030_s0 + $0x28] sm:$0xff]  ;;  %v2468_v36 = vor.u32 %v2781_v19, %v2465_v20  ;;  %v2985_v37 = vpack.c.bf16 %v67_v24, %v60_v23 }
  0x42   :  { %1369 = vmatpush.bf16.msrb.mxu3 %v1892_v43  ;;  %v68_v30 = vld [vmem:[%s3030_s0 + $0x60] sm:$0xff]  ;;  %v2593_v34 = vld [vmem:[#allocation2 + $0x5f0] sm:$0xf0]  ;;  %v1972_v41 = vor.u32 %v2657_v25, %v1969_v28 }
  0x43   :  { %1382 = vmatpush.bf16.msra.mxu2 %v2036_v38  ;;  %v2813_v33 = vld [vmem:[#allocation2 + $0x5e4] sm:$0xf]  ;;  %v2193_v38 = vld [vmem:[#allocation2 + $0x2d0] sm:$0xf0]  ;;  %v2987_v42 = vpack.c.bf16 %v68_v30, %v61_v29 }
  0x44   :  { %1328 = vmatpush.bf16.msrb.mxu0 %v2384_v52  ;;  %v2713_v35 = vld [vmem:[#allocation2 + $0x2c4] sm:$0xf]  ;;  %v2321_v40 = vld [vmem:[#allocation2 + $0x3d0] sm:$0xf0]  ;;  %v2596_v45 = vor.u32 %v2813_v33, %v2593_v34 }
  0x45   :  { %1342 = vmatpush.bf16.msrb.mxu1 %v2512_v57  ;;  %v2745_v39 = vld [vmem:[#allocation2 + $0x3c4] sm:$0xf]  ;;  %v2449_v44 = vld [vmem:[#allocation2 + $0x4d0] sm:$0xf0]  ;;  %v2196_v46 = vor.u32 %v2713_v35, %v2193_v38 }
  0x46   :  { %1370 = vmatpush.bf16.msrb.mxu3 %v1876_v58  ;;  %v2777_v43 = vld [vmem:[#allocation2 + $0x4c4] sm:$0xf]  ;;  %v2324_v47 = vor.u32 %v2745_v39, %v2321_v40  ;;  %v2577_v49 = vld [vmem:[#allocation2 + $0x5d0] sm:$0xf0] }
  0x47   :  { %1383 = vmatpush.bf16.msra.mxu2 %v2020_v51  ;;  %v2809_v48 = vld [vmem:[#allocation2 + $0x5c4] sm:$0xf]  ;;  %v2452_v52 = vor.u32 %v2777_v43, %v2449_v44  ;;  %v2177_v53 = vld [vmem:[#allocation2 + $0x2b0] sm:$0xf0] }
  0x48   :  { %1329 = vmatpush.bf16.msrb.mxu0 %v2368_v5  ;;  %v2709_v51 = vld [vmem:[#allocation2 + $0x2a4] sm:$0xf]  ;;  %v2305_v57 = vld [vmem:[#allocation2 + $0x3b0] sm:$0xf0]  ;;  %v2580_v61 = vor.u32 %v2809_v48, %v2577_v49 }
  0x49   :  { %1343 = vmatpush.bf16.msrb.mxu1 %v2496_v10  ;;  %v2741_v56 = vld [vmem:[#allocation2 + $0x3a4] sm:$0xf]  ;;  %v2433_v59 = vld [vmem:[#allocation2 + $0x4b0] sm:$0xf0]  ;;  %v2180_v62 = vor.u32 %v2709_v51, %v2177_v53 }
  0x4a   :  { %1371 = vmatpush.bf16.msrb.mxu3 %v1860_v11  ;;  %v2773_v58 = vld [vmem:[#allocation2 + $0x4a4] sm:$0xf]  ;;  %v2308_v63 = vor.u32 %v2741_v56, %v2305_v57  ;;  %v2561_v1 = vld [vmem:[#allocation2 + $0x5b0] sm:$0xf0] }
  0x4b   :  { %1384 = vmatpush.bf16.msra.mxu2 %v2004_v4  ;;  %v2805_v0 = vld [vmem:[#allocation2 + $0x5a4] sm:$0xf]  ;;  %v2436_v3 = vor.u32 %v2773_v58, %v2433_v59  ;;  %v2161_v4 = vld [vmem:[#allocation2 + $0x290] sm:$0xf0] }
  0x4c   :  { %1330 = vmatpush.bf16.msrb.mxu0 %v2352_v22  ;;  %v2705_v2 = vld [vmem:[#allocation2 + $0x284] sm:$0xf]  ;;  %v2289_v6 = vld [vmem:[#allocation2 + $0x390] sm:$0xf0]  ;;  %v2564_v10 = vor.u32 %v2805_v0, %v2561_v1  ;;  %v1959_v0 = vld [vmem:[#allocation2 + $0xe8] sm:$0xf] }
  0x4d   :  { %1344 = vmatpush.bf16.msrb.mxu1 %v2480_v26  ;;  %v2737_v5 = vld [vmem:[#allocation2 + $0x384] sm:$0xf]  ;;  %v2417_v9 = vld [vmem:[#allocation2 + $0x490] sm:$0xf0]  ;;  %v2164_v11 = vor.u32 %v2705_v2, %v2161_v4  ;;  %v2656_v1 = vld [vmem:[#allocation2 + $0xf4] sm:$0xf0] }
  0x4e   :  { %1372 = vmatpush.bf16.msrb.mxu3 %v1844_v27  ;;  %v2769_v7 = vld [vmem:[#allocation2 + $0x484] sm:$0xf]  ;;  %v2292_v12 = vor.u32 %v2737_v5, %v2289_v6  ;;  %v2545_v14 = vld [vmem:[#allocation2 + $0x590] sm:$0xf0]  ;;  %v2215_v5 = vld [vmem:[#allocation2 + $0x2e8] sm:$0xf] }
  0x4f   :  { %1385 = vmatpush.bf16.msra.mxu2 %v1988_v21  ;;  %1331 = vmatmul.bf16.vlgmr.msrb.gmra.mxu0 %v2985_v37  ;;  %v2801_v13 = vld [vmem:[#allocation2 + $0x584] sm:$0xf]  ;;  %v2420_v16 = vor.u32 %v2769_v7, %v2417_v9  ;;  %v2145_v17 = vld [vmem:[#allocation2 + $0x270] sm:$0xf0]  ;;  %v2720_v6 = vld [vmem:[#allocation2 + $0x2f4] sm:$0xf0] }
  0x50   :  { %1393 = vmatpush.bf16.msra.mxu0 %v2212_v31  ;;  %1345 = vmatmul.bf16.vlgmr.msrb.gmra.mxu1 %v2987_v42  ;;  %v2701_v15 = vld [vmem:[#allocation2 + $0x264] sm:$0xf]  ;;  %v2273_v19 = vld [vmem:[#allocation2 + $0x370] sm:$0xf0]  ;;  %v2548_v22 = vor.u32 %v2801_v13, %v2545_v14  ;;  %v1960_v13 = vor.u32 %v2656_v1, %v1959_v0  ;;  %v2343_v14 = vld [vmem:[#allocation2 + $0x3e8] sm:$0xf] }
  0x51   :  { %1407 = vmatpush.bf16.msra.mxu1 %v2340_v32  ;;  %1373 = vmatmul.bf16.vlgmr.msrb.gmra.mxu3 %v2947_v55  ;;  %v2733_v18 = vld [vmem:[#allocation2 + $0x364] sm:$0xf]  ;;  %v2401_v21 = vld [vmem:[#allocation2 + $0x470] sm:$0xf0]  ;;  %v2148_v23 = vor.u32 %v2701_v15, %v2145_v17  ;;  %v2752_v15 = vld [vmem:[#allocation2 + $0x3f4] sm:$0xf0] }
  0x52   :  { %1421 = vmatpush.bf16.msra.mxu3 %v2468_v36  ;;  %v2765_v20 = vld [vmem:[#allocation2 + $0x464] sm:$0xf]  ;;  %v2276_v24 = vor.u32 %v2733_v18, %v2273_v19  ;;  %v2529_v26 = vld [vmem:[#allocation2 + $0x570] sm:$0xf0]  ;;  %v2087_v17 = vld [vmem:[#allocation2 + $0x1e8] sm:$0xf]  ;;  %v2216_v19 = vor.u32 %v2720_v6, %v2215_v5 }
  0x53   :  { %1386 = vmatpush.bf16.msra.mxu2 %v1972_v41  ;;  %v2797_v25 = vld [vmem:[#allocation2 + $0x564] sm:$0xf]  ;;  %v2404_v28 = vor.u32 %v2765_v20, %v2401_v21  ;;  %v2129_v29 = vld [vmem:[#allocation2 + $0x250] sm:$0xf0]  ;;  %v2688_v18 = vld [vmem:[#allocation2 + $0x1f4] sm:$0xf0] }
  0x54   :  { %1394 = vmatpush.bf16.msra.mxu0 %v2196_v46  ;;  %v2697_v27 = vld [vmem:[#allocation2 + $0x244] sm:$0xf]  ;;  %v2257_v31 = vld [vmem:[#allocation2 + $0x350] sm:$0xf0]  ;;  %v2532_v34 = vor.u32 %v2797_v25, %v2529_v26  ;;  %v1943_v21 = vld [vmem:[#allocation2 + $0xc8] sm:$0xf]  ;;  %v2088_v26 = vor.u32 %v2688_v18, %v2087_v17 }
  0x55   :  { %1408 = vmatpush.bf16.msra.mxu1 %v2324_v47  ;;  %v2729_v30 = vld [vmem:[#allocation2 + $0x344] sm:$0xf]  ;;  %v2385_v33 = vld [vmem:[#allocation2 + $0x450] sm:$0xf0]  ;;  %v2132_v35 = vor.u32 %v2697_v27, %v2129_v29  ;;  %v2716_v25 = vld [vmem:[#allocation2 + $0x2d4] sm:$0xf0] }
  0x56   :  { %1422 = vmatpush.bf16.msra.mxu3 %v2452_v52  ;;  %1387 = vmatmul.bf16.vlgmr.msra.gmra.mxu2 %v2959_v8  ;;  %v2761_v32 = vld [vmem:[#allocation2 + $0x444] sm:$0xf]  ;;  %v2260_v36 = vor.u32 %v2729_v30, %v2257_v31  ;;  %v2513_v39 = vld [vmem:[#allocation2 + $0x550] sm:$0xf0]  ;;  %v2327_v27 = vld [vmem:[#allocation2 + $0x3c8] sm:$0xf] }
  0x57   :  { %1435 = vmatpush.bf16.msrb.mxu2 %v2596_v45  ;;  %v2793_v38 = vld [vmem:[#allocation2 + $0x544] sm:$0xf]  ;;  %v2388_v41 = vor.u32 %v2761_v32, %v2385_v33  ;;  %v2113_v43 = vld [vmem:[#allocation2 + $0x230] sm:$0xf0]  ;;  %v2071_v30 = vld [vmem:[#allocation2 + $0x1c8] sm:$0xf] }
  0x58   :  { %1395 = vmatpush.bf16.msra.mxu0 %v2180_v62  ;;  %v2693_v40 = vld [vmem:[#allocation2 + $0x224] sm:$0xf]  ;;  %v2241_v45 = vld [vmem:[#allocation2 + $0x330] sm:$0xf0]  ;;  %v2516_v48 = vor.u32 %v2793_v38, %v2513_v39  ;;  %v2684_v31 = vld [vmem:[#allocation2 + $0x1d4] sm:$0xf0] }
  0x59   :  { %1409 = vmatpush.bf16.msra.mxu1 %v2308_v63  ;;  %v2725_v44 = vld [vmem:[#allocation2 + $0x324] sm:$0xf]  ;;  %v2369_v47 = vld [vmem:[#allocation2 + $0x430] sm:$0xf0]  ;;  %v2116_v52 = vor.u32 %v2693_v40, %v2113_v43  ;;  %v1927_v33 = vld [vmem:[#allocation2 + $0xa8] sm:$0xf]  ;;  %v2072_v39 = vor.u32 %v2684_v31, %v2071_v30 }
  0x5a   :  { %1423 = vmatpush.bf16.msra.mxu3 %v2436_v3  ;;  %v2757_v46 = vld [vmem:[#allocation2 + $0x424] sm:$0xf]  ;;  %v2497_v51 = vld [vmem:[#allocation2 + $0x530] sm:$0xf0]  ;;  %v2244_v53 = vor.u32 %v2725_v44, %v2241_v45  ;;  %v2712_v38 = vld [vmem:[#allocation2 + $0x2b4] sm:$0xf0] }
  0x5b   :  { %1436 = vmatpush.bf16.msrb.mxu2 %v2580_v61  ;;  %v2789_v49 = vld [vmem:[#allocation2 + $0x524] sm:$0xf]  ;;  %v2097_v57 = vld [vmem:[#allocation2 + $0x210] sm:$0xf0]  ;;  %v2372_v59 = vor.u32 %v2757_v46, %v2369_v47  ;;  %v2311_v40 = vld [vmem:[#allocation2 + $0x3a8] sm:$0xf] }
  0x5c   :  { %1396 = vmatpush.bf16.msra.mxu0 %v2164_v11  ;;  %v2689_v56 = vld [vmem:[#allocation2 + $0x204] sm:$0xf]  ;;  %v2225_v61 = vld [vmem:[#allocation2 + $0x310] sm:$0xf0]  ;;  %v2500_v3 = vor.u32 %v2789_v49, %v2497_v51  ;;  %v2055_v44 = vld [vmem:[#allocation2 + $0x1a8] sm:$0xf] }
  0x5d   :  { %1410 = vmatpush.bf16.msra.mxu1 %v2292_v12  ;;  %v2721_v58 = vld [vmem:[#allocation2 + $0x304] sm:$0xf]  ;;  %v2353_v63 = vld [vmem:[#allocation2 + $0x410] sm:$0xf0]  ;;  %v2100_v7 = vor.u32 %v2689_v56, %v2097_v57  ;;  %v2680_v45 = vld [vmem:[#allocation2 + $0x1b4] sm:$0xf0] }
  0x5e   :  { %1424 = vmatpush.bf16.msra.mxu3 %v2420_v16  ;;  %v2753_v62 = vld [vmem:[#allocation2 + $0x404] sm:$0xf]  ;;  %v2609_v4 = vld [vmem:[#allocation2 + $0x610] sm:$0xf0]  ;;  %v2228_v9 = vor.u32 %v2721_v58, %v2225_v61  ;;  %v1911_v47 = vld [vmem:[#allocation2 + $0x88] sm:$0xf] }
  0x5f   :  { %1437 = vmatpush.bf16.msrb.mxu2 %v2564_v10  ;;  %v2817_v2 = vld [vmem:[#allocation2 + $0x604] sm:$0xf]  ;;  %v2481_v11 = vld [vmem:[#allocation2 + $0x510] sm:$0xf0]  ;;  %v2356_v12 = vor.u32 %v2753_v62, %v2353_v63  ;;  %v2167_v51 = vld [vmem:[#allocation2 + $0x288] sm:$0xf] }
  0x60   :  { %1397 = vmatpush.bf16.msra.mxu0 %v2148_v23  ;;  %v2785_v10 = vld [vmem:[#allocation2 + $0x504] sm:$0xf]  ;;  %v2612_v16 = vor.u32 %v2817_v2, %v2609_v4  ;;  %v2344_v23 = vor.u32 %v2752_v15, %v2343_v14  ;;  %v2295_v56 = vld [vmem:[#allocation2 + $0x388] sm:$0xf]  ;;  %v2740_v57 = vld [vmem:[#allocation2 + $0x394] sm:$0xf0] }
  0x61   :  { %1411 = vmatpush.bf16.msra.mxu1 %v2276_v24  ;;  %v2484_v20 = vor.u32 %v2785_v10, %v2481_v11  ;;  %v2199_v24 = vld [vmem:[#allocation2 + $0x2c8] sm:$0xf]  ;;  %v2676_v61 = vld [vmem:[#allocation2 + $0x194] sm:$0xf0]  ;;  %v2296_v1 = vor.u32 %v2740_v57, %v2295_v56  ;;  %v2654_v56 = vld [vmem:[#allocation2 + $0xec] sm:$0xf] }
  0x62   :  { %1425 = vmatpush.bf16.msra.mxu3 %v2404_v28  ;;  %v2748_v28 = vld [vmem:[#allocation2 + $0x3d4] sm:$0xf0]  ;;  %v2200_v32 = vor.u32 %v2716_v25, %v2199_v24  ;;  %v1895_v63 = vld [vmem:[#allocation2 + $0x68] sm:$0xf]  ;;  %v1961_v57 = vld [vmem:[#allocation2 + $0xf8] sm:$0xf0] }
  0x63   :  { %1438 = vmatpush.bf16.msrb.mxu2 %v2548_v22  ;;  %v2652_v22 = vld [vmem:[#allocation2 + $0xd4] sm:$0xf0]  ;;  %v2151_v2 = vld [vmem:[#allocation2 + $0x268] sm:$0xf] }
  0x64   :  { %1398 = vmatpush.bf16.msra.mxu0 %v2132_v35  ;;  %v1944_v29 = vor.u32 %v2652_v22, %v1943_v21  ;;  %v2328_v35 = vor.u32 %v2748_v28, %v2327_v27  ;;  %v2640_v0 = vld [vmem:[#allocation2 + $0x74] sm:$0xf0]  ;;  %v2279_v5 = vld [vmem:[#allocation2 + $0x368] sm:$0xf] }
  0x65   :  { %1412 = vmatpush.bf16.msra.mxu1 %v2260_v36  ;;  %v2183_v36 = vld [vmem:[#allocation2 + $0x2a8] sm:$0xf]  ;;  %v2736_v6 = vld [vmem:[#allocation2 + $0x374] sm:$0xf0] }
  0x66   :  { %1426 = vmatpush.bf16.msra.mxu3 %v2388_v41  ;;  %v2744_v41 = vld [vmem:[#allocation2 + $0x3b4] sm:$0xf0]  ;;  %v2184_v46 = vor.u32 %v2712_v38, %v2183_v36  ;;  %v2280_v14 = vor.u32 %v2736_v6, %v2279_v5  ;;  %v2135_v15 = vld [vmem:[#allocation2 + $0x248] sm:$0xf]  ;;  %v1964_v6 = vor.u32 %v2654_v56, %v1961_v57 }
  0x67   :  { %1439 = vmatpush.bf16.msrb.mxu2 %v2532_v34  ;;  %v2648_v34 = vld [vmem:[#allocation2 + $0xb4] sm:$0xf0]  ;;  %v2312_v49 = vor.u32 %v2744_v41, %v2311_v40  ;;  %v2263_v18 = vld [vmem:[#allocation2 + $0x348] sm:$0xf] }
  0x68   :  { %1399 = vmatpush.bf16.msra.mxu0 %v2116_v52  ;;  %v1928_v43 = vor.u32 %v2648_v34, %v1927_v33  ;;  %v2708_v52 = vld [vmem:[#allocation2 + $0x294] sm:$0xf0]  ;;  %v2007_v21 = vld [vmem:[#allocation2 + $0x148] sm:$0xf] }
  0x69   :  { %1413 = vmatpush.bf16.msra.mxu1 %v2244_v53  ;;  %v2056_v53 = vor.u32 %v2680_v45, %v2055_v44  ;;  %v2168_v62 = vor.u32 %v2708_v52, %v2167_v51  ;;  %v2672_v10 = vld [vmem:[#allocation2 + $0x174] sm:$0xf0]  ;;  %v1863_v24 = vld [vmem:[#allocation2 + $0x28] sm:$0xf] }
  0x6a   :  { %1427 = vmatpush.bf16.msra.mxu3 %v2372_v59  ;;  %v2039_v59 = vld [vmem:[#allocation2 + $0x188] sm:$0xf]  ;;  %v2668_v22 = vld [vmem:[#allocation2 + $0x154] sm:$0xf0] }
  0x6b   :  { %1440 = vmatpush.bf16.msrb.mxu2 %v2516_v48  ;;  %v2644_v48 = vld [vmem:[#allocation2 + $0x94] sm:$0xf0]  ;;  %v2040_v4 = vor.u32 %v2676_v61, %v2039_v59  ;;  %v2119_v27 = vld [vmem:[#allocation2 + $0x228] sm:$0xf] }
  0x6c   :  { %1400 = vmatpush.bf16.msra.mxu0 %v2100_v7  ;;  %v1912_v58 = vor.u32 %v2644_v48, %v1911_v47  ;;  %v1896_v7 = vor.u32 %v2640_v0, %v1895_v63  ;;  %v2632_v25 = vld [vmem:[#allocation2 + $0x34] sm:$0xf0]  ;;  %v2247_v30 = vld [vmem:[#allocation2 + $0x328] sm:$0xf] }
  0x6d   :  { %1414 = vmatpush.bf16.msra.mxu1 %v2228_v9  ;;  %v2023_v9 = vld [vmem:[#allocation2 + $0x168] sm:$0xf]  ;;  %v2696_v28 = vld [vmem:[#allocation2 + $0x234] sm:$0xf0] }
  0x6e   :  { %1428 = vmatpush.bf16.msra.mxu3 %v2356_v12  ;;  %v1879_v12 = vld [vmem:[#allocation2 + $0x48] sm:$0xf]  ;;  %v2024_v17 = vor.u32 %v2672_v10, %v2023_v9  ;;  %v2728_v31 = vld [vmem:[#allocation2 + $0x334] sm:$0xf0]  ;;  %v2120_v36 = vor.u32 %v2696_v28, %v2119_v27  ;;  %v2650_v9 = vld [vmem:[#allocation2 + $0xcc] sm:$0xf] }
  0x6f   :  { %1441 = vmatpush.bf16.msrb.mxu2 %v2500_v3  ;;  %1401 = vmatmul.bf16.vlgmr.msra.gmra.mxu0 %v2945_v54  ;;  %v2704_v3 = vld [vmem:[#allocation2 + $0x274] sm:$0xf0]  ;;  %v1991_v33 = vld [vmem:[#allocation2 + $0x128] sm:$0xf]  ;;  %v2248_v41 = vor.u32 %v2728_v31, %v2247_v30  ;;  %v1945_v10 = vld [vmem:[#allocation2 + $0xd8] sm:$0xf0] }
  0x70   :  { %1491 = vmatpush.bf16.msrb.mxu0 %v2216_v19  ;;  %1415 = vmatmul.bf16.vlgmr.msra.gmra.mxu1 %v2949_v60  ;;  %v2152_v11 = vor.u32 %v2704_v3, %v2151_v2  ;;  %v2732_v19 = vld [vmem:[#allocation2 + $0x354] sm:$0xf0]  ;;  %v2103_v44 = vld [vmem:[#allocation2 + $0x208] sm:$0xf]  ;;  %v2686_v3 = vld [vmem:[#allocation2 + $0x1ec] sm:$0xf] }
  0x71   :  { %1463 = vmatpush.bf16.msrb.mxu1 %v1960_v13  ;;  %1429 = vmatmul.bf16.vlgmr.msra.gmra.mxu3 %v2985_v37  ;;  %v2636_v13 = vld [vmem:[#allocation2 + $0x54] sm:$0xf0]  ;;  %v2599_v61 = vld [vmem:[#allocation2 + $0x5e8] sm:$0xf]  ;;  %v2057_v30 = vld [vmem:[#allocation2 + $0x1b8] sm:$0xf0] }
  0x72   :  { %1456 = vmatpush.bf16.msrb.mxu3 %v2612_v16  ;;  %v2700_v16 = vld [vmem:[#allocation2 + $0x254] sm:$0xf0]  ;;  %v2455_v63 = vld [vmem:[#allocation2 + $0x4c8] sm:$0xf] }
  0x73   :  { %1442 = vmatpush.bf16.msrb.mxu2 %v2484_v20  ;;  %v1880_v20 = vor.u32 %v2636_v13, %v1879_v12  ;;  %v2664_v34 = vld [vmem:[#allocation2 + $0x134] sm:$0xf0]  ;;  %v2583_v13 = vld [vmem:[#allocation2 + $0x5c8] sm:$0xf] }
  0x74   :  { %1492 = vmatpush.bf16.msrb.mxu0 %v2200_v32  ;;  %v1864_v32 = vor.u32 %v2632_v25, %v1863_v24  ;;  %v2628_v38 = vld [vmem:[#allocation2 + $0x14] sm:$0xf0]  ;;  %v1992_v47 = vor.u32 %v2664_v34, %v1991_v33  ;;  %v2567_v25 = vld [vmem:[#allocation2 + $0x5a8] sm:$0xf]  ;;  %v2642_v33 = vld [vmem:[#allocation2 + $0x8c] sm:$0xf] }
  0x75   :  { %1464 = vmatpush.bf16.msrb.mxu1 %v1944_v29  ;;  %v2008_v29 = vor.u32 %v2668_v22, %v2007_v21  ;;  %v2784_v40 = vld [vmem:[#allocation2 + $0x4f4] sm:$0xf0]  ;;  %v2646_v21 = vld [vmem:[#allocation2 + $0xac] sm:$0xf]  ;;  %v1929_v22 = vld [vmem:[#allocation2 + $0xb8] sm:$0xf0] }
  0x76   :  { %1477 = vmatpush.bf16.msra.mxu3 %v2088_v26  ;;  %1443 = vmatmul.bf16.vlgmr.msrb.gmra.mxu2 %v2987_v42  ;;  %v2264_v26 = vor.u32 %v2732_v19, %v2263_v18  ;;  %v2692_v45 = vld [vmem:[#allocation2 + $0x214] sm:$0xf0]  ;;  %v2073_v18 = vld [vmem:[#allocation2 + $0x1d8] sm:$0xf0]  ;;  %v1948_v19 = vor.u32 %v2650_v9, %v1945_v10  ;;  %v2423_v27 = vld [vmem:[#allocation2 + $0x488] sm:$0xf]  ;;  %v1932_v31 = vor.u32 %v2646_v21, %v1929_v22 }
  0x77   :  { %1505 = vmatpush.bf16.msra.mxu2 %v2344_v23  ;;  %v2136_v23 = vor.u32 %v2700_v16, %v2135_v15  ;;  %v2724_v48 = vld [vmem:[#allocation2 + $0x314] sm:$0xf0]  ;;  %v2104_v59 = vor.u32 %v2692_v45, %v2103_v44  ;;  %v2439_v15 = vld [vmem:[#allocation2 + $0x4a8] sm:$0xf]  ;;  %v1913_v34 = vld [vmem:[#allocation2 + $0x98] sm:$0xf0] }
  0x78   :  { %1493 = vmatpush.bf16.msrb.mxu0 %v2184_v46  ;;  %v2231_v46 = vld [vmem:[#allocation2 + $0x308] sm:$0xf]  ;;  %v2820_v51 = vld [vmem:[#allocation2 + $0x614] sm:$0xf0]  ;;  %v2041_v44 = vld [vmem:[#allocation2 + $0x198] sm:$0xf0]  ;;  %v1916_v45 = vor.u32 %v2642_v33, %v1913_v34 }
  0x79   :  { %1465 = vmatpush.bf16.msrb.mxu1 %v1928_v43  ;;  %v1975_v43 = vld [vmem:[#allocation2 + $0x108] sm:$0xf]  ;;  %v2232_v0 = vor.u32 %v2724_v48, %v2231_v46  ;;  %v2776_v16 = vld [vmem:[#allocation2 + $0x4b4] sm:$0xf0]  ;;  %v1897_v48 = vld [vmem:[#allocation2 + $0x78] sm:$0xf0] }
  0x7a   :  { %1478 = vmatpush.bf16.msra.mxu3 %v2072_v39  ;;  %v2471_v39 = vld [vmem:[#allocation2 + $0x4e8] sm:$0xf]  ;;  %v2772_v28 = vld [vmem:[#allocation2 + $0x494] sm:$0xf0]  ;;  %v2009_v9 = vld [vmem:[#allocation2 + $0x158] sm:$0xf0] }
  0x7b   :  { %1506 = vmatpush.bf16.msra.mxu2 %v2328_v35  ;;  %v1847_v35 = vld [vmem:[#allocation2 + $0x8] sm:$0xf]  ;;  %v2764_v57 = vld [vmem:[#allocation2 + $0x454] sm:$0xf0]  ;;  %v1993_v21 = vld [vmem:[#allocation2 + $0x138] sm:$0xf0] }
  0x7c   :  { %1494 = vmatpush.bf16.msrb.mxu0 %v2168_v62  ;;  %v1848_v52 = vor.u32 %v2628_v38, %v1847_v35  ;;  %v2816_v62 = vld [vmem:[#allocation2 + $0x5f4] sm:$0xf0]  ;;  %v2424_v35 = vor.u32 %v2772_v28, %v2423_v27  ;;  %v2551_v38 = vld [vmem:[#allocation2 + $0x588] sm:$0xf]  ;;  %v2626_v27 = vld [vmem:[#allocation2 + $0xc] sm:$0xf] }
  0x7d   :  { %1466 = vmatpush.bf16.msrb.mxu1 %v1912_v58  ;;  %v2472_v58 = vor.u32 %v2784_v40, %v2471_v39  ;;  %v2804_v39 = vld [vmem:[#allocation2 + $0x594] sm:$0xf0]  ;;  %v2407_v40 = vld [vmem:[#allocation2 + $0x468] sm:$0xf]  ;;  %v1849_v28 = vld [vmem:[#allocation2 + $0x18] sm:$0xf0] }
  0x7e   :  { %1479 = vmatpush.bf16.msra.mxu3 %v2056_v53  ;;  %v2660_v53 = vld [vmem:[#allocation2 + $0x114] sm:$0xf0]  ;;  %v2552_v46 = vor.u32 %v2804_v39, %v2551_v38  ;;  %v2391_v56 = vld [vmem:[#allocation2 + $0x448] sm:$0xf]  ;;  %v2345_v33 = vld [vmem:[#allocation2 + $0x3f8] sm:$0xf0]  ;;  %v1852_v39 = vor.u32 %v2626_v27, %v1849_v28 }
  0x7f   :  { %1507 = vmatpush.bf16.msra.mxu2 %v2312_v49  ;;  %v2615_v49 = vld [vmem:[#allocation2 + $0x608] sm:$0xf]  ;;  %v1976_v5 = vor.u32 %v2660_v53, %v1975_v43  ;;  %v2674_v43 = vld [vmem:[#allocation2 + $0x18c] sm:$0xf]  ;;  %v2800_v53 = vld [vmem:[#allocation2 + $0x574] sm:$0xf0] }
  0x80   :  { %1495 = vmatpush.bf16.msrb.mxu0 %v2152_v11  ;;  %v2616_v2 = vor.u32 %v2820_v51, %v2615_v49  ;;  %v2044_v51 = vor.u32 %v2674_v43, %v2041_v44  ;;  %v2714_v38 = vld [vmem:[#allocation2 + $0x2cc] sm:$0xf]  ;;  %v1977_v43 = vld [vmem:[#allocation2 + $0x118] sm:$0xf0] }
  0x81   :  { %1467 = vmatpush.bf16.msrb.mxu1 %v1896_v7  ;;  %2622 = vmatmul.msk.bf16.vlgmr.msrb.gmra.mxu3 %vm1263_vm0, %v2969_v50  ;;  %v2600_v7 = vor.u32 %v2816_v62, %v2599_v61  ;;  %v2281_v28 = vld [vmem:[#allocation2 + $0x378] sm:$0xf0] }
  0x82   :  { %1480 = vmatpush.bf16.msra.mxu3 %v2040_v4  ;;  %v2089_v4 = vld [vmem:[#allocation2 + $0x1f8] sm:$0xf0] }
  0x83   :  { %1508 = vmatpush.bf16.msra.mxu2 %v2296_v1  ;;  %v2780_v1 = vld [vmem:[#allocation2 + $0x4d4] sm:$0xf0]  ;;  %v2092_v12 = vor.u32 %v2686_v3, %v2089_v4  ;;  %v2519_v3 = vld [vmem:[#allocation2 + $0x548] sm:$0xf] }
  0x84   :  { %1496 = vmatpush.bf16.msrb.mxu0 %v2136_v23  ;;  %v2456_v11 = vor.u32 %v2780_v1, %v2455_v63  ;;  %v2440_v23 = vor.u32 %v2776_v16, %v2439_v15  ;;  %v2634_v63 = vld [vmem:[#allocation2 + $0x4c] sm:$0xf]  ;;  %v2392_v1 = vor.u32 %v2764_v57, %v2391_v56  ;;  %v2796_v4 = vld [vmem:[#allocation2 + $0x554] sm:$0xf0]  ;;  %v2503_v16 = vld [vmem:[#allocation2 + $0x528] sm:$0xf] }
  0x85   :  { %1468 = vmatpush.bf16.msrb.mxu1 %v1880_v20  ;;  %v2778_v56 = vld [vmem:[#allocation2 + $0x4cc] sm:$0xf]  ;;  %v2457_v57 = vld [vmem:[#allocation2 + $0x4d8] sm:$0xf0] }
  0x86   :  { %1481 = vmatpush.bf16.msra.mxu3 %v2024_v17  ;;  %v2682_v17 = vld [vmem:[#allocation2 + $0x1cc] sm:$0xf] }
  0x87   :  { %1509 = vmatpush.bf16.msra.mxu2 %v2280_v14  ;;  %v2812_v14 = vld [vmem:[#allocation2 + $0x5d4] sm:$0xf0]  ;;  %v2076_v24 = vor.u32 %v2682_v17, %v2073_v18  ;;  %v2359_v18 = vld [vmem:[#allocation2 + $0x408] sm:$0xf] }
  0x88   :  { %1497 = vmatpush.bf16.msrb.mxu0 %v2120_v36  ;;  %v2584_v20 = vor.u32 %v2812_v14, %v2583_v13  ;;  %v1865_v13 = vld [vmem:[#allocation2 + $0x38] sm:$0xf0]  ;;  %v2792_v17 = vld [vmem:[#allocation2 + $0x534] sm:$0xf0] }
  0x89   :  { %1469 = vmatpush.bf16.msrb.mxu1 %v1864_v32 }
  0x8a   :  { %1482 = vmatpush.bf16.msra.mxu3 %v2008_v29  ;;  %v2678_v29 = vld [vmem:[#allocation2 + $0x1ac] sm:$0xf] }
  0x8b   :  { %1510 = vmatpush.bf16.msra.mxu2 %v2264_v26  ;;  %v2808_v26 = vld [vmem:[#allocation2 + $0x5b4] sm:$0xf0]  ;;  %v2060_v36 = vor.u32 %v2678_v29, %v2057_v30 }
  0x8c   :  { %1498 = vmatpush.bf16.msrb.mxu0 %v2104_v59  ;;  %v2568_v32 = vor.u32 %v2808_v26, %v2567_v25  ;;  %v2025_v59 = vld [vmem:[#allocation2 + $0x178] sm:$0xf0]  ;;  %v2504_v25 = vor.u32 %v2792_v17, %v2503_v16  ;;  %v2487_v26 = vld [vmem:[#allocation2 + $0x508] sm:$0xf] }
  0x8d   :  { %1470 = vmatpush.bf16.msrb.mxu1 %v1848_v52  ;;  %v2535_v52 = vld [vmem:[#allocation2 + $0x568] sm:$0xf]  ;;  %v2297_v17 = vld [vmem:[#allocation2 + $0x398] sm:$0xf0] }
  0x8e   :  { %1483 = vmatpush.bf16.msra.mxu3 %v1992_v47  ;;  %v2638_v47 = vld [vmem:[#allocation2 + $0x6c] sm:$0xf]  ;;  %v2536_v62 = vor.u32 %v2800_v53, %v2535_v52  ;;  %v2329_v53 = vld [vmem:[#allocation2 + $0x3d8] sm:$0xf0] }
  0x8f   :  { %1511 = vmatpush.bf16.msra.mxu2 %v2248_v41  ;;  %1499 = vmatmul.bf16.vlgmr.msrb.gmra.mxu0 %v2945_v54  ;;  %v2768_v41 = vld [vmem:[#allocation2 + $0x474] sm:$0xf0]  ;;  %v1900_v61 = vor.u32 %v2638_v47, %v1897_v48 }
  0x90   :  { %1554 = vmatpush.bf16.msra.mxu0 %v2616_v2  ;;  %1471 = vmatmul.bf16.vlgmr.msrb.gmra.mxu1 %v2947_v55  ;;  %v2408_v49 = vor.u32 %v2768_v41, %v2407_v40  ;;  %v2201_v40 = vld [vmem:[#allocation2 + $0x2d8] sm:$0xf0]  ;;  %v2658_v41 = vld [vmem:[#allocation2 + $0x10c] sm:$0xf] }
  0x91   :  { %1519 = vmatpush.bf16.msra.mxu1 %v2472_v58  ;;  %v2670_v58 = vld [vmem:[#allocation2 + $0x16c] sm:$0xf]  ;;  %v1980_v52 = vor.u32 %v2658_v41, %v1977_v43  ;;  %v2393_v43 = vld [vmem:[#allocation2 + $0x458] sm:$0xf0] }
  0x92   :  { %1484 = vmatpush.bf16.msra.mxu3 %v1976_v5  ;;  %v2028_v2 = vor.u32 %v2670_v58, %v2025_v59  ;;  %v2375_v5 = vld [vmem:[#allocation2 + $0x428] sm:$0xf]  ;;  %v2710_v59 = vld [vmem:[#allocation2 + $0x2ac] sm:$0xf] }
  0x93   :  { %1512 = vmatpush.bf16.msra.mxu2 %v2232_v0  ;;  %v1881_v0 = vld [vmem:[#allocation2 + $0x58] sm:$0xf0]  ;;  %v2762_v41 = vld [vmem:[#allocation2 + $0x44c] sm:$0xf] }
  0x94   :  { %1575 = vmatpush.bf16.msrb.mxu0 %v2092_v12  ;;  %v1884_v10 = vor.u32 %v2634_v63, %v1881_v0  ;;  %v2630_v12 = vld [vmem:[#allocation2 + $0x2c] sm:$0xf]  ;;  %v2585_v63 = vld [vmem:[#allocation2 + $0x5d8] sm:$0xf0] }
  0x95   :  { %1520 = vmatpush.bf16.msra.mxu1 %v2456_v11  ;;  %1485 = vmatmul.bf16.vlgmr.msra.gmra.mxu3 %v2959_v8  ;;  %v2520_v11 = vor.u32 %v2796_v4, %v2519_v3  ;;  %v1868_v22 = vor.u32 %v2630_v12, %v1865_v13  ;;  %v2313_v4 = vld [vmem:[#allocation2 + $0x3b8] sm:$0xf0] }
  0x96   :  { %1533 = vmatpush.bf16.msrb.mxu3 %v2600_v7  ;;  %1513 = vmatmul.bf16.vlgmr.msra.gmra.mxu2 %v2949_v60  ;;  %v2666_v7 = vld [vmem:[#allocation2 + $0x14c] sm:$0xf]  ;;  %v2569_v12 = vld [vmem:[#allocation2 + $0x5b8] sm:$0xf0] }
  0x97   :  { %1561 = vmatpush.bf16.msrb.mxu2 %v1964_v6  ;;  %v2760_v6 = vld [vmem:[#allocation2 + $0x434] sm:$0xf0]  ;;  %v2012_v15 = vor.u32 %v2666_v7, %v2009_v9  ;;  %v2706_v9 = vld [vmem:[#allocation2 + $0x28c] sm:$0xf] }
  0x98   :  { %1576 = vmatpush.bf16.msrb.mxu0 %v2076_v24  ;;  %v2376_v14 = vor.u32 %v2760_v6, %v2375_v5  ;;  %v2217_v24 = vld [vmem:[#allocation2 + $0x2f8] sm:$0xf0]  ;;  %v2774_v5 = vld [vmem:[#allocation2 + $0x4ac] sm:$0xf] }
  0x99   :  { %1521 = vmatpush.bf16.msra.mxu1 %v2440_v23  ;;  %v2718_v23 = vld [vmem:[#allocation2 + $0x2ec] sm:$0xf]  ;;  %v2441_v6 = vld [vmem:[#allocation2 + $0x4b8] sm:$0xf0] }
  0x9a   :  { %1534 = vmatpush.bf16.msrb.mxu3 %v2584_v20  ;;  %v2662_v20 = vld [vmem:[#allocation2 + $0x12c] sm:$0xf]  ;;  %v2220_v34 = vor.u32 %v2718_v23, %v2217_v24 }
  0x9b   :  { %1562 = vmatpush.bf16.msrb.mxu2 %v1948_v19  ;;  %v2756_v19 = vld [vmem:[#allocation2 + $0x414] sm:$0xf0]  ;;  %v1996_v30 = vor.u32 %v2662_v20, %v1993_v21  ;;  %v2702_v21 = vld [vmem:[#allocation2 + $0x26c] sm:$0xf] }
  0x9c   :  { %1577 = vmatpush.bf16.msrb.mxu0 %v2060_v36  ;;  %v2360_v29 = vor.u32 %v2756_v19, %v2359_v18  ;;  %v2473_v36 = vld [vmem:[#allocation2 + $0x4f8] sm:$0xf0]  ;;  %v2770_v18 = vld [vmem:[#allocation2 + $0x48c] sm:$0xf] }
  0x9d   :  { %1522 = vmatpush.bf16.msra.mxu1 %v2424_v35  ;;  %v2782_v35 = vld [vmem:[#allocation2 + $0x4ec] sm:$0xf]  ;;  %v2425_v19 = vld [vmem:[#allocation2 + $0x498] sm:$0xf0] }
  0x9e   :  { %1535 = vmatpush.bf16.msrb.mxu3 %v2568_v32  ;;  %v2750_v32 = vld [vmem:[#allocation2 + $0x3ec] sm:$0xf]  ;;  %v2476_v48 = vor.u32 %v2782_v35, %v2473_v36 }
  0x9f   :  { %1563 = vmatpush.bf16.msrb.mxu2 %v1932_v31  ;;  %2623 = vmatmul.msk.bf16.vlgmr.msra.gmra.mxu0 %vm1263_vm0, %v2969_v50  ;;  %v2788_v31 = vld [vmem:[#allocation2 + $0x514] sm:$0xf0]  ;;  %v2348_v47 = vor.u32 %v2750_v32, %v2345_v33  ;;  %v2802_v23 = vld [vmem:[#allocation2 + $0x58c] sm:$0xf] }
  0xa0   :  { %1578 = vmatpush.bf16.msrb.mxu0 %v2044_v51  ;;  %v2488_v44 = vor.u32 %v2788_v31, %v2487_v26  ;;  %v2204_v51 = vor.u32 %v2714_v38, %v2201_v40  ;;  %v2734_v26 = vld [vmem:[#allocation2 + $0x36c] sm:$0xf]  ;;  %v2265_v40 = vld [vmem:[#allocation2 + $0x358] sm:$0xf0] }
  0xa1   :  { %1523 = vmatpush.bf16.msra.mxu1 %v2408_v49  ;;  %v2746_v49 = vld [vmem:[#allocation2 + $0x3cc] sm:$0xf]  ;;  %v2284_v35 = vor.u32 %v2734_v26, %v2281_v28 }
  0xa2   :  { %1536 = vmatpush.bf16.msrb.mxu3 %v2552_v46  ;;  %v2601_v46 = vld [vmem:[#allocation2 + $0x5f8] sm:$0xf0]  ;;  %v2332_v0 = vor.u32 %v2746_v49, %v2329_v53  ;;  %v2698_v32 = vld [vmem:[#allocation2 + $0x24c] sm:$0xf] }
  0xa3   :  { %1564 = vmatpush.bf16.msrb.mxu2 %v1916_v45  ;;  %v2814_v45 = vld [vmem:[#allocation2 + $0x5ec] sm:$0xf] }
  0xa4   :  { %1579 = vmatpush.bf16.msrb.mxu0 %v2028_v2  ;;  %v2604_v58 = vor.u32 %v2814_v45, %v2601_v46  ;;  %v2742_v2 = vld [vmem:[#allocation2 + $0x3ac] sm:$0xf]  ;;  %v2121_v46 = vld [vmem:[#allocation2 + $0x238] sm:$0xf0] }
  0xa5   :  { %1524 = vmatpush.bf16.msra.mxu1 %v2392_v1  ;;  %v2460_v1 = vor.u32 %v2778_v56, %v2457_v57  ;;  %v2316_v13 = vor.u32 %v2742_v2, %v2313_v4  ;;  %v2798_v33 = vld [vmem:[#allocation2 + $0x56c] sm:$0xf]  ;;  %v2249_v56 = vld [vmem:[#allocation2 + $0x338] sm:$0xf0] }
  0xa6   :  { %1537 = vmatpush.bf16.msrb.mxu3 %v2536_v62  ;;  %v2810_v62 = vld [vmem:[#allocation2 + $0x5cc] sm:$0xf]  ;;  %v2617_v2 = vld [vmem:[#allocation2 + $0x618] sm:$0xf0] }
  0xa7   :  { %1565 = vmatpush.bf16.msrb.mxu2 %v1900_v61  ;;  %v2185_v61 = vld [vmem:[#allocation2 + $0x2b8] sm:$0xf0]  ;;  %v2588_v7 = vor.u32 %v2810_v62, %v2585_v63  ;;  %v2730_v38 = vld [vmem:[#allocation2 + $0x34c] sm:$0xf] }
  0xa8   :  { %1580 = vmatpush.bf16.msrb.mxu0 %v2012_v15  ;;  %v2188_v3 = vor.u32 %v2710_v59, %v2185_v61  ;;  %v2738_v15 = vld [vmem:[#allocation2 + $0x38c] sm:$0xf]  ;;  %v2268_v49 = vor.u32 %v2730_v38, %v2265_v40  ;;  %v2105_v62 = vld [vmem:[#allocation2 + $0x218] sm:$0xf0] }
  0xa9   :  { %1525 = vmatpush.bf16.msra.mxu1 %v2376_v14  ;;  %v2444_v14 = vor.u32 %v2774_v5, %v2441_v6  ;;  %v2300_v24 = vor.u32 %v2738_v15, %v2297_v17  ;;  %v2694_v45 = vld [vmem:[#allocation2 + $0x22c] sm:$0xf] }
  0xaa   :  { %1538 = vmatpush.bf16.msrb.mxu3 %v2520_v11  ;;  %v2806_v11 = vld [vmem:[#allocation2 + $0x5ac] sm:$0xf]  ;;  %v2124_v53 = vor.u32 %v2694_v45, %v2121_v46  ;;  %v1691_v45 = vld [vmem:[#allocation4 + $0xc0] sm:$0xff]  ;;  %v1690_v46 = vld [vmem:[#allocation4 + $0xb8] sm:$0xff] }
  0xab   :  { %1566 = vmatpush.bf16.msrb.mxu2 %v1884_v10  ;;  %v2169_v10 = vld [vmem:[#allocation2 + $0x298] sm:$0xf0]  ;;  %v2572_v20 = vor.u32 %v2806_v11, %v2569_v12  ;;  %v2758_v57 = vld [vmem:[#allocation2 + $0x42c] sm:$0xf] }
  0xac   :  { %1581 = vmatpush.bf16.msrb.mxu0 %v1996_v30  ;;  %v2172_v16 = vor.u32 %v2706_v9, %v2169_v10  ;;  %v2409_v30 = vld [vmem:[#allocation2 + $0x478] sm:$0xf0]  ;;  %v2690_v61 = vld [vmem:[#allocation2 + $0x20c] sm:$0xf] }
  0xad   :  { %1526 = vmatpush.bf16.msra.mxu1 %v2360_v29  ;;  %v2766_v29 = vld [vmem:[#allocation2 + $0x46c] sm:$0xf]  ;;  %v2108_v5 = vor.u32 %v2690_v61, %v2105_v62  ;;  %v2361_v11 = vld [vmem:[#allocation2 + $0x418] sm:$0xf0] }
  0xae   :  { %1539 = vmatpush.bf16.msrb.mxu3 %v2504_v25  ;;  %v2428_v25 = vor.u32 %v2770_v18, %v2425_v19  ;;  %v2412_v36 = vor.u32 %v2766_v29, %v2409_v30  ;;  %v2790_v63 = vld [vmem:[#allocation2 + $0x52c] sm:$0xf]  ;;  %v3012_v18 = vld [vmem:[%s3032_s2] sm:$0xf]  ;;  %v1678_v30 = vld [vmem:[#allocation4 + $0x58] sm:$0xff] }
  0xaf   :  { %1567 = vmatpush.bf16.msrb.mxu2 %v1868_v22  ;;  %v2153_v22 = vld [vmem:[#allocation2 + $0x278] sm:$0xf0]  ;;  %v2722_v6 = vld [vmem:[#allocation2 + $0x30c] sm:$0xf]  ;;  %v1276_v15 = vpop.f32.mrf.mxu0 }
  0xb0   :  { %1527 = vmatmul.bf16.vlgmr.msra.gmra.mxu1 %v2985_v37  ;;  %1582 = vmatpush.bf16.msrb.mxu0 %v1980_v52  ;;  %v2156_v27 = vor.u32 %v2702_v21, %v2153_v22  ;;  %v2726_v52 = vld [vmem:[#allocation2 + $0x32c] sm:$0xf]  ;;  %v1670_v62 = vld [vmem:[#allocation4 + $0x18] sm:$0xff] }
  0xb1   :  { %1589 = vmatpush.bf16.msrb.mxu1 %v2220_v34  ;;  %v2537_v34 = vld [vmem:[#allocation2 + $0x578] sm:$0xf0]  ;;  %v2754_v10 = vld [vmem:[#allocation2 + $0x40c] sm:$0xf] }
  0xb2   :  { %1540 = vmatpush.bf16.msrb.mxu3 %v2488_v44  ;;  %v2540_v44 = vor.u32 %v2798_v33, %v2537_v34  ;;  %v2364_v17 = vor.u32 %v2754_v10, %v2361_v11  ;;  %v1680_v26 = vld [vmem:[#allocation4 + $0x68] sm:$0xff]  ;;  %v1694_v34 = vld [vmem:[#allocation4 + $0xd8] sm:$0xff]  ;;  %v1685_v11 = vld [vmem:[#allocation4 + $0x90] sm:$0xff] }
  0xb3   :  { %1568 = vmatpush.bf16.msrb.mxu2 %v1852_v39  ;;  %1583 = vmatmul.bf16.vlgmr.msrb.gmra.mxu0 %v2959_v8  ;;  %v2137_v8 = vld [vmem:[#allocation2 + $0x258] sm:$0xf0]  ;;  %v1290_v22 = vpop.f32.mrf.mxu1  ;;  %v1696_v29 = vld [vmem:[#allocation4 + $0xe8] sm:$0xff] }
  0xb4   :  { %1631 = vmatpush.bf16.msra.mxu0 %v2604_v58  ;;  %v2140_v39 = vor.u32 %v2698_v32, %v2137_v8  ;;  %v2377_v58 = vld [vmem:[#allocation2 + $0x438] sm:$0xf0]  ;;  %v1304_v19 = vpop.f32.mrf.mxu2  ;;  %v1695_v8 = vld [vmem:[#allocation4 + $0xe0] sm:$0xff]  ;;  %v1688_v61 = vld [vmem:[#allocation4 + $0xa8] sm:$0xff] }
  0xb5   :  { %1590 = vmatpush.bf16.msrb.mxu1 %v2204_v51  ;;  %1541 = vmatmul.bf16.vlgmr.msrb.gmra.mxu3 %v2987_v42  ;;  %v2396_v51 = vor.u32 %v2762_v41, %v2393_v43  ;;  %v2380_v4 = vor.u32 %v2758_v57, %v2377_v58  ;;  %v1692_v41 = vld [vmem:[#allocation4 + $0xc8] sm:$0xff]  ;;  %v1674_v43 = vld [vmem:[#allocation4 + $0x38] sm:$0xff]  ;;  %v1689_v57 = vld [vmem:[#allocation4 + $0xb0] sm:$0xff] }
  0xb6   :  { %1603 = vmatpush.bf16.msra.mxu3 %v2348_v47  ;;  %1569 = vmatmul.bf16.vlgmr.msrb.gmra.mxu2 %v2947_v55  ;;  %v2553_v55 = vld [vmem:[#allocation2 + $0x598] sm:$0xf0]  ;;  %v2794_v47 = vld [vmem:[#allocation2 + $0x54c] sm:$0xf] }
  0xb7   :  { %1617 = vmatpush.bf16.msra.mxu2 %v2476_v48  ;;  %v2556_v31 = vor.u32 %v2802_v23, %v2553_v55  ;;  %v2521_v48 = vld [vmem:[#allocation2 + $0x558] sm:$0xf0]  ;;  %v275_v23 = vperm.slane %v3012_v18, 0  ;;  %v1681_v55 = vld [vmem:[#allocation4 + $0x70] sm:$0xff]  ;;  %v1278_v28 = vpop.f32.mrf.mxu0 }
  0xb8   :  { %1632 = vmatpush.bf16.msra.mxu0 %v2588_v7  ;;  %v2524_v59 = vor.u32 %v2794_v47, %v2521_v48  ;;  %v2233_v7 = vld [vmem:[#allocation2 + $0x318] sm:$0xf0] }
  0xb9   :  { %1591 = vmatpush.bf16.msrb.mxu1 %v2188_v3  ;;  %v2252_v3 = vor.u32 %v2726_v52, %v2249_v56  ;;  %v1279_v38 = vadd.f32 %v1278_v28, %v275_v23  ;;  %v1672_v56 = vld [vmem:[#allocation4 + $0x28] sm:$0xff]  ;;  %v1714_v28 = vld [vmem:[#allocation4 + $0x178] sm:$0xff] }
  0xba   :  { %1604 = vmatpush.bf16.msra.mxu3 %v2332_v0  ;;  %v2505_v0 = vld [vmem:[#allocation2 + $0x538] sm:$0xf0] }
  0xbb   :  { %1618 = vmatpush.bf16.msra.mxu2 %v2460_v1  ;;  %v2818_v1 = vld [vmem:[#allocation2 + $0x60c] sm:$0xf]  ;;  %v2508_v9 = vor.u32 %v2790_v63, %v2505_v0  ;;  %v1687_v63 = vld [vmem:[#allocation4 + $0xa0] sm:$0xff] }
  0xbc   :  { %1633 = vmatpush.bf16.msra.mxu0 %v2572_v20  ;;  %v2620_v12 = vor.u32 %v2818_v1, %v2617_v2  ;;  %v1682_v20 = vld [vmem:[#allocation4 + $0x78] sm:$0xff]  ;;  %v1306_v32 = vpop.f32.mrf.mxu2 }
  0xbd   :  { %1592 = vmatpush.bf16.msrb.mxu1 %v2172_v16  ;;  %v2236_v16 = vor.u32 %v2722_v6, %v2233_v7  ;;  %v1686_v1 = vld [vmem:[#allocation4 + $0x98] sm:$0xff] }
  0xbe   :  { %1605 = vmatpush.bf16.msra.mxu3 %v2316_v13  ;;  %v2786_v13 = vld [vmem:[#allocation2 + $0x50c] sm:$0xf] }
  0xbf   :  { %1619 = vmatpush.bf16.msra.mxu2 %v2444_v14  ;;  %v2489_v14 = vld [vmem:[#allocation2 + $0x518] sm:$0xf0] }
  0xc0   :  { %1634 = vmatpush.bf16.msra.mxu0 %v2556_v31  ;;  %v2492_v21 = vor.u32 %v2786_v13, %v2489_v14  ;;  %v1318_v31 = vpop.f32.mrf.mxu3  ;;  %v1684_v13 = vld [vmem:[#allocation4 + $0x88] sm:$0xff] }
  0xc1   :  { %1593 = vmatpush.bf16.msrb.mxu1 %v2156_v27  ;;  %v1277_v27 = vadd.f32 %v1276_v15, %v275_v23 }
  0xc2   :  { %1606 = vmatpush.bf16.msra.mxu3 %v2300_v24  ;;  %v1698_v24 = vld [vmem:[#allocation4 + $0xf8] sm:$0xff] }
  0xc3   :  { %1620 = vmatpush.bf16.msra.mxu2 %v2428_v25  ;;  %v1697_v25 = vld [vmem:[#allocation4 + $0xf0] sm:$0xff]  ;;  %v1291_v33 = vadd.f32 %v1290_v22, %v1277_v27 }
  0xc4   :  { %1635 = vmatpush.bf16.msra.mxu0 %v2540_v44  ;;  %v1360_v44 = vpop.f32.mrf.mxu2 }
  0xc5   :  { %1594 = vmatpush.bf16.msrb.mxu1 %v2140_v39  ;;  %v1675_v39 = vld [vmem:[#allocation4 + $0x40] sm:$0xff] }
  0xc6   :  { %1607 = vmatpush.bf16.msra.mxu3 %v2284_v35  ;;  %v1676_v35 = vld [vmem:[#allocation4 + $0x48] sm:$0xff] }
  0xc7   :  { %1621 = vmatpush.bf16.msra.mxu2 %v2412_v36  ;;  %v1305_v36 = vadd.f32 %v1304_v19, %v1291_v33  ;;  %v1711_v33 = vld [vmem:[#allocation4 + $0x160] sm:$0xff] }
  0xc8   :  { %1636 = vmatpush.bf16.msra.mxu0 %v2524_v59  ;;  %v1671_v59 = vld [vmem:[#allocation4 + $0x20] sm:$0xff] }
  0xc9   :  { %1595 = vmatpush.bf16.msrb.mxu1 %v2124_v53  ;;  %v1319_v47 = vadd.f32 %v1318_v31, %v1305_v36  ;;  %v1710_v36 = vld [vmem:[#allocation4 + $0x158] sm:$0xff] }
  0xca   :  { %1608 = vmatpush.bf16.msra.mxu3 %v2268_v49  ;;  %v1673_v49 = vld [vmem:[#allocation4 + $0x30] sm:$0xff] }
  0xcb   :  { %1622 = vmatpush.bf16.msra.mxu2 %v2396_v51  ;;  %v1320_v51 = vpop.f32.mrf.mxu3 }
  0xcc   :  { %1637 = vmatpush.bf16.msra.mxu0 %v2508_v9  ;;  %v1332_v40 = vpop.f32.mrf.mxu0  ;;  %v1668_v9 = vld [vmem:[#allocation4 + $0x8] sm:$0xff] }
  0xcd   :  { %1596 = vmatpush.bf16.msrb.mxu1 %v2108_v5  ;;  %v1333_v53 = vadd.f32 %v1332_v40, %v1319_v47 }
  0xce   :  { %1609 = vmatpush.bf16.msra.mxu3 %v2252_v3  ;;  %v1669_v3 = vld [vmem:[#allocation4 + $0x10] sm:$0xff] }
  0xcf   :  { %1623 = vmatpush.bf16.msra.mxu2 %v2380_v4  ;;  %v1362_v4 = vpop.f32.mrf.mxu2 }
  0xd0   :  { %1597 = vmatmul.bf16.vlgmr.msrb.gmra.mxu1 %v2945_v54  ;;  %1638 = vmatpush.bf16.msra.mxu0 %v2492_v21  ;;  %v1679_v54 = vld [vmem:[#allocation4 + $0x60] sm:$0xff]  ;;  %v276_v21 = vperm.slane %v3012_v18, 1 }
  0xd1   :  { %1652 = vmatpush.bf16.msra.mxu1 %v2620_v12  ;;  %v1667_v12 = vld [vmem:[#allocation4] sm:$0xff] }
  0xd2   :  { %1610 = vmatpush.bf16.msra.mxu3 %v2236_v16  ;;  %v1683_v16 = vld [vmem:[#allocation4 + $0x80] sm:$0xff] }
  0xd3   :  { %1624 = vmatpush.bf16.msra.mxu2 %v2364_v17  ;;  %1639 = vmatmul.bf16.vlgmr.msra.gmra.mxu0 %v2987_v42  ;;  %v1693_v42 = vld [vmem:[#allocation4 + $0xd0] sm:$0xff] }
  0xd4   :  { %v1334_v0 = vpop.f32.mrf.mxu0  ;;  %v1374_v5 = vpop.f32.mrf.mxu3 }
  0xd5   :  { %1758 = vmatpush.msrb.mxu1 %v1698_v24  ;;  %1611 = vmatmul.bf16.vlgmr.msra.gmra.mxu3 %v2949_v60  ;;  %v1677_v60 = vld [vmem:[#allocation4 + $0x50] sm:$0xff]  ;;  %v1375_v23 = vadd.f32 %v1374_v5, %v276_v21  ;;  %v1728_v5 = vld [vmem:[#allocation4 + $0x1e8] sm:$0xff] }
  0xd6   :  { %1735 = vmatpush.msrb.mxu3 %v1682_v20  ;;  %1625 = vmatmul.bf16.vlgmr.msra.gmra.mxu2 %v2985_v37  ;;  %v1292_v37 = vpop.f32.mrf.mxu1 }
  0xd7   :  { %1759 = vmatpush.msrb.mxu1 %v1697_v25  ;;  %v1293_v48 = vadd.f32 %v1292_v37, %v1279_v38  ;;  %1781 = vmatpush.msrb.mxu2 %v1714_v28  ;;  %v1709_v38 = vld [vmem:[#allocation4 + $0x150] sm:$0xff] }
  0xd8   :  { %1736 = vmatpush.msrb.mxu3 %v1681_v55 }
  0xd9   :  { %1760 = vmatpush.msrb.mxu1 %v1696_v29  ;;  %v1307_v58 = vadd.f32 %v1306_v32, %v1293_v48  ;;  %v1388_v19 = vpop.f32.mrf.mxu2  ;;  %v1713_v29 = vld [vmem:[#allocation4 + $0x170] sm:$0xff] }
  0xda   :  { %1737 = vmatpush.msrb.mxu3 %v1680_v26  ;;  %v1389_v26 = vadd.f32 %v1388_v19, %v1375_v23  ;;  %1782 = vmatpush.msrb.mxu2 %v1713_v29 }
  0xdb   :  { %1761 = vmatpush.msrb.mxu1 %v1695_v8  ;;  %v1321_v2 = vadd.f32 %v1320_v51, %v1307_v58  ;;  %v1712_v8 = vld [vmem:[#allocation4 + $0x168] sm:$0xff]  ;;  %v1706_v51 = vld [vmem:[#allocation4 + $0x138] sm:$0xff] }
  0xdc   :  { %1738 = vmatpush.msrb.mxu3 %v1679_v54  ;;  %v1376_v20 = vpop.f32.mrf.mxu3  ;;  %1783 = vmatpush.msrb.mxu2 %v1712_v8 }
  0xdd   :  { %1762 = vmatpush.msrb.mxu1 %v1694_v34  ;;  %v1335_v7 = vadd.f32 %v1334_v0, %v1321_v2 }
  0xde   :  { %1739 = vmatpush.msrb.mxu3 %v1678_v30  ;;  %v1346_v52 = vpop.f32.mrf.mxu1  ;;  %v1377_v30 = vadd.f32 %v1376_v20, %v276_v21  ;;  %1784 = vmatpush.msrb.mxu2 %v1711_v33  ;;  %v1718_v33 = vld [vmem:[#allocation4 + $0x198] sm:$0xff] }
  0xdf   :  { %1763 = vmatpush.msrb.mxu1 %v1693_v42 }
  0xe0   :  { %1740 = vmatpush.msrb.mxu3 %v1677_v60  ;;  %2624 = vmatmul.msk.bf16.vlgmr.msra.gmra.mxu1 %vm1263_vm0, %v2969_v50  ;;  %v1347_v50 = vadd.f32 %v1346_v52, %v1333_v53  ;;  %v1705_v52 = vld [vmem:[#allocation4 + $0x130] sm:$0xff] }
  0xe1   :  { %1764 = vmatpush.msrb.mxu1 %v1692_v41  ;;  %v1390_v25 = vpop.f32.mrf.mxu2  ;;  %1785 = vmatpush.msrb.mxu2 %v1710_v36  ;;  %v1708_v41 = vld [vmem:[#allocation4 + $0x148] sm:$0xff] }
  0xe2   :  { %1741 = vmatpush.msrb.mxu3 %v1676_v35  ;;  %v1361_v6 = vadd.f32 %v1360_v44, %v1347_v50  ;;  %v1391_v37 = vadd.f32 %v1390_v25, %v1377_v30  ;;  %v1702_v50 = vld [vmem:[#allocation4 + $0x118] sm:$0xff]  ;;  %v1721_v25 = vld [vmem:[#allocation4 + $0x1b0] sm:$0xff]  ;;  %v1719_v30 = vld [vmem:[#allocation4 + $0x1a0] sm:$0xff] }
  0xe3   :  { %1765 = vmatpush.msrb.mxu1 %v1691_v45  ;;  %1786 = vmatpush.msrb.mxu2 %v1709_v38  ;;  %v1716_v38 = vld [vmem:[#allocation4 + $0x188] sm:$0xff] }
  0xe4   :  { %1742 = vmatpush.msrb.mxu3 %v1675_v39  ;;  %v1659_v14 = vmax.f32 %v1361_v6, 0.0  ;;  %v277_v6 = vperm.slane %v3012_v18, 2 }
  0xe5   :  { %1766 = vmatpush.msrb.mxu1 %v1690_v46  ;;  %v1707_v46 = vld [vmem:[#allocation4 + $0x140] sm:$0xff]  ;;  %1787 = vmatpush.msrb.mxu2 %v1708_v41 }
  0xe6   :  { %1743 = vmatpush.msrb.mxu3 %v1674_v43  ;;  %v1348_v10 = vpop.f32.mrf.mxu1  ;;  %v1715_v41 = vld [vmem:[#allocation4 + $0x180] sm:$0xff] }
  0xe7   :  { %1767 = vmatpush.msrb.mxu1 %v1689_v57  ;;  %v1349_v15 = vadd.f32 %v1348_v10, %v1335_v7  ;;  %1788 = vmatpush.msrb.mxu2 %v1707_v46  ;;  %v1727_v10 = vld [vmem:[#allocation4 + $0x1e0] sm:$0xff] }
  0xe8   :  { %1744 = vmatpush.msrb.mxu3 %v1673_v49 }
  0xe9   :  { %1768 = vmatpush.msrb.mxu1 %v1688_v61  ;;  %v1363_v17 = vadd.f32 %v1362_v4, %v1349_v15  ;;  %1789 = vmatpush.msrb.mxu2 %v1706_v51  ;;  %v1729_v4 = vld [vmem:[#allocation4 + $0x1f0] sm:$0xff] }
  0xea   :  { %1745 = vmatpush.msrb.mxu3 %v1672_v56  ;;  %v1704_v56 = vld [vmem:[#allocation4 + $0x128] sm:$0xff] }
  0xeb   :  { %1769 = vmatpush.msrb.mxu1 %v1687_v63  ;;  %v1663_v22 = vmax.f32 %v1363_v17, 0.0  ;;  %1790 = vmatpush.msrb.mxu2 %v1705_v52  ;;  %v1700_v63 = vld [vmem:[#allocation4 + $0x108] sm:$0xff]  ;;  %v1723_v17 = vld [vmem:[#allocation4 + $0x1c0] sm:$0xff] }
  0xec   :  { %1746 = vmatpush.msrb.mxu3 %v1671_v59  ;;  %v1402_v55 = vpop.f32.mrf.mxu0  ;;  %v1703_v59 = vld [vmem:[#allocation4 + $0x120] sm:$0xff] }
  0xed   :  { %1770 = vmatpush.msrb.mxu1 %v1686_v1  ;;  %v1403_v54 = vadd.f32 %v1402_v55, %v1389_v26  ;;  %1791 = vmatpush.msrb.mxu2 %v1704_v56  ;;  %v1699_v1 = vld [vmem:[#allocation4 + $0x100] sm:$0xff]  ;;  %v1722_v55 = vld [vmem:[#allocation4 + $0x1b8] sm:$0xff] }
  0xee   :  { %1747 = vmatpush.msrb.mxu3 %v1670_v62  ;;  %v1416_v27 = vpop.f32.mrf.mxu1  ;;  %v1701_v62 = vld [vmem:[#allocation4 + $0x110] sm:$0xff] }
  0xef   :  { %1771 = vmatpush.msrb.mxu1 %v1685_v11  ;;  %v1417_v32 = vadd.f32 %v1416_v27, %v1403_v54  ;;  %1792 = vmatpush.msrb.mxu2 %v1703_v59  ;;  %v1726_v11 = vld [vmem:[#allocation4 + $0x1d8] sm:$0xff]  ;;  %v1720_v54 = vld [vmem:[#allocation4 + $0x1a8] sm:$0xff] }
  0xf0   :  { %1748 = vmatpush.msrb.mxu3 %v1669_v3  ;;  %v1730_v3 = vld [vmem:[#allocation4 + $0x1f8] sm:$0xff] }
  0xf1   :  { %1772 = vmatpush.msrb.mxu1 %v1684_v13  ;;  %1793 = vmatpush.msrb.mxu2 %v1702_v50 }
  0xf2   :  { %1749 = vmatpush.msrb.mxu3 %v1668_v9  ;;  %1804 = vmatpush.msrb.mxu0 %v1730_v3 }
  0xf3   :  { %1773 = vmatpush.msrb.mxu1 %v1683_v16  ;;  %1794 = vmatpush.msrb.mxu2 %v1701_v62  ;;  %v1724_v16 = vld [vmem:[#allocation4 + $0x1c8] sm:$0xff] }
  0xf4   :  { %1750 = vmatpush.msrb.mxu3 %v1667_v12  ;;  %v1430_v24 = vpop.f32.mrf.mxu3  ;;  %v1404_v60 = vpop.f32.mrf.mxu0  ;;  %1805 = vmatpush.msrb.mxu0 %v1729_v4 }
  0xf5   :  { %1751 = vmatmul.f32.vlgmr.msrb.gmra.mxu3 %v1659_v14  ;;  %v1431_v35 = vadd.f32 %v1430_v24, %v1417_v32  ;;  %v1405_v42 = vadd.f32 %v1404_v60, %v1391_v37  ;;  %1795 = vmatpush.msrb.mxu2 %v1700_v63  ;;  %v1725_v14 = vld [vmem:[#allocation4 + $0x1d0] sm:$0xff] }
  0xf6   :  { %v1418_v39 = vpop.f32.mrf.mxu1  ;;  %1806 = vmatpush.msrb.mxu0 %v1728_v5 }
  0xf7   :  { %v1419_v44 = vadd.f32 %v1418_v39, %v1405_v42  ;;  %1796 = vmatpush.msrb.mxu2 %v1699_v1 }
  0xf8   :  { %1807 = vmatpush.msrb.mxu0 %v1727_v10 }
  0xf9   :  { %v1444_v34 = vpop.f32.mrf.mxu2 }
  0xfa   :  { %v1445_v40 = vadd.f32 %v1444_v34, %v1431_v35  ;;  %1808 = vmatpush.msrb.mxu0 %v1726_v11  ;;  %v1717_v35 = vld [vmem:[#allocation4 + $0x190] sm:$0xff] }
  0xfc   :  { %v1432_v31 = vpop.f32.mrf.mxu3  ;;  %1809 = vmatpush.msrb.mxu0 %v1725_v14 }
  0xfd   :  { %1754 = vmatmul.f32.gmra.mxu3 %v1663_v22  ;;  %v1433_v47 = vadd.f32 %v1432_v31, %v1419_v44 }
  0xfe   :  { %1810 = vmatpush.msrb.mxu0 %v1724_v16 }
 0x100   :  { %1811 = vmatpush.msrb.mxu0 %v1723_v17 }
 0x101   :  { %v1446_v49 = vpop.f32.mrf.mxu2 }
 0x102   :  { %v1447_v53 = vadd.f32 %v1446_v49, %v1433_v47  ;;  %1812 = vmatpush.msrb.mxu0 %v1722_v55 }
 0x104   :  { %v1458_v43 = vpop.f32.mrf.mxu3  ;;  %1813 = vmatpush.msrb.mxu0 %v1721_v25 }
 0x105   :  { %v1459_v45 = vadd.f32 %v1458_v43, %v1445_v40 }
 0x106   :  { %1814 = vmatpush.msrb.mxu0 %v1720_v54 }
 0x107   :  { %v1660_v48 = vmax.f32 %v1459_v45, 0.0 }
 0x108   :  { %1815 = vmatpush.msrb.mxu0 %v1719_v30 }
 0x109   :  { %1774 = vmatmul.f32.vlgmr.msrb.gmra.mxu1 %v1660_v48  ;;  %v278_v48 = vperm.slane %v3012_v18, 3 }
 0x10a   :  { %1816 = vmatpush.msrb.mxu0 %v1718_v33 }
 0x10c   :  { %v1460_v57 = vpop.f32.mrf.mxu3  ;;  %v1500_v0 = vpop.f32.mrf.mxu0  ;;  %1817 = vmatpush.msrb.mxu0 %v1717_v35 }
 0x10d   :  { %v1461_v58 = vadd.f32 %v1460_v57, %v1447_v53  ;;  %v1472_v2 = vpop.f32.mrf.mxu1 }
 0x10e   :  { %v1473_v12 = vadd.f32 %v1472_v2, %v277_v6  ;;  %1818 = vmatpush.msrb.mxu0 %v1716_v38 }
 0x10f   :  { %v1664_v61 = vmax.f32 %v1461_v58, 0.0 }
 0x110   :  { %1819 = vmatpush.msrb.mxu0 %v1715_v41 }
 0x111   :  { %1777 = vmatmul.f32.gmra.mxu1 %v1664_v61 }
 0x114   :  { %v1502_v9 = vpop.f32.mrf.mxu0 }
 0x115   :  { %v1474_v13 = vpop.f32.mrf.mxu1 }
 0x116   :  { %v1475_v23 = vadd.f32 %v1474_v13, %v277_v6 }
 0x118   :  { %v1486_v7 = vpop.f32.mrf.mxu3 }
 0x119   :  { %v1487_v15 = vadd.f32 %v1486_v7, %v1473_v12  ;;  %v1514_v20 = vpop.f32.mrf.mxu2 }
 0x11b   :  { %v1501_v22 = vadd.f32 %v1500_v0, %v1487_v15 }
 0x11c   :  { %v1556_v19 = vpop.f32.mrf.mxu0 }
 0x11d   :  { %v1515_v26 = vadd.f32 %v1514_v20, %v1501_v22  ;;  %v2832_v20 = vld [vmem:[%s3034_s4] ss:$0 sm:$0xff] }
 0x120   :  { %v1488_v21 = vpop.f32.mrf.mxu3 }
 0x121   :  { %v1489_v27 = vadd.f32 %v1488_v21, %v1475_v23  ;;  %v1516_v60 = vpop.f32.mrf.mxu2 }
 0x123   :  { %v1503_v31 = vadd.f32 %v1502_v9, %v1489_v27 }
 0x124   :  { %v1558_v8 = vpop.f32.mrf.mxu0 }
 0x125   :  { %v1517_v42 = vadd.f32 %v1516_v60, %v1503_v31 }
 0x12d   :  { %v1528_v24 = vpop.f32.mrf.mxu1 }
 0x12e   :  { %v1529_v28 = vadd.f32 %v1528_v24, %v1515_v26 }
 0x130   :  { %v1584_v44 = vpop.f32.mrf.mxu0 }
 0x135   :  { %v1530_v37 = vpop.f32.mrf.mxu1 }
 0x136   :  { %v1531_v39 = vadd.f32 %v1530_v37, %v1517_v42 }
 0x138   :  { %v1542_v29 = vpop.f32.mrf.mxu3  ;;  %v1586_v52 = vpop.f32.mrf.mxu0 }
 0x139   :  { %v1543_v32 = vadd.f32 %v1542_v29, %v1529_v28  ;;  %v1570_v46 = vpop.f32.mrf.mxu2 }
 0x13a   :  { %v1571_v49 = vadd.f32 %v1570_v46, %v278_v48 }
 0x13b   :  { %v1557_v34 = vadd.f32 %v1556_v19, %v1543_v32 }
 0x13c   :  { %v1585_v56 = vadd.f32 %v1584_v44, %v1571_v49 }
 0x13d   :  { %v1661_v36 = vmax.f32 %v1557_v34, 0.0 }
 0x13f   :  { %1797 = vmatmul.f32.vlgmr.msrb.gmra.mxu2 %v1661_v36 }
 0x140   :  { %v1544_v40 = vpop.f32.mrf.mxu3 }
 0x141   :  { %v1545_v43 = vadd.f32 %v1544_v40, %v1531_v39  ;;  %v1572_v53 = vpop.f32.mrf.mxu2 }
 0x142   :  { %v1573_v61 = vadd.f32 %v1572_v53, %v278_v48 }
 0x143   :  { %v1559_v45 = vadd.f32 %v1558_v8, %v1545_v43 }
 0x144   :  { %v1587_v1 = vadd.f32 %v1586_v52, %v1573_v61 }
 0x145   :  { %v1665_v47 = vmax.f32 %v1559_v45, 0.0 }
 0x147   :  { %1800 = vmatmul.f32.gmra.mxu2 %v1665_v47 }
 0x14d   :  { %v1598_v51 = vpop.f32.mrf.mxu1 }
 0x14e   :  { %v1599_v57 = vadd.f32 %v1598_v51, %v1585_v56 }
 0x150   :  { %v1640_v63 = vpop.f32.mrf.mxu0 }
 0x155   :  { %v1600_v58 = vpop.f32.mrf.mxu1 }
 0x156   :  { %v1601_v3 = vadd.f32 %v1600_v58, %v1587_v1 }
 0x158   :  { %v1612_v59 = vpop.f32.mrf.mxu3  ;;  %v1642_v11 = vpop.f32.mrf.mxu0 }
 0x159   :  { %v1613_v50 = vadd.f32 %v1612_v59, %v1599_v57  ;;  %v1626_v62 = vpop.f32.mrf.mxu2 }
 0x15b   :  { %v1627_v0 = vadd.f32 %v1626_v62, %v1613_v50 }
 0x15d   :  { %v1641_v2 = vadd.f32 %v1640_v63, %v1627_v0  ;;  %v1654_v4 = vpop.f32.mrf.mxu1 }
 0x15f   :  { %v1655_v5 = vadd.f32 %v1654_v4, %v1641_v2 }
 0x160   :  { %v1614_v6 = vpop.f32.mrf.mxu3 }
 0x161   :  { %v1615_v18 = vadd.f32 %v1614_v6, %v1601_v3  ;;  %v1662_v7 = vmax.f32 %v1655_v5, 0.0  ;;  %v1628_v9 = vpop.f32.mrf.mxu2 }
 0x163   :  { %v1629_v10 = vadd.f32 %v1628_v9, %v1615_v18  ;;  %1820 = vmatmul.f32.vlgmr.msrb.gmra.mxu0 %v1662_v7 }
 0x165   :  { %v1643_v12 = vadd.f32 %v1642_v11, %v1629_v10  ;;  %v1656_v13 = vpop.f32.mrf.mxu1 }
 0x167   :  { %v1657_v14 = vadd.f32 %v1656_v13, %v1643_v12 }
 0x169   :  { %v1666_v15 = vmax.f32 %v1657_v14, 0.0 }
 0x16b   :  { %1823 = vmatmul.f32.gmra.mxu0 %v1666_v15 }
 0x178   :  { %v1752_v16 = vpop.f32.mrf.mxu3 }
 0x179   :  { %v1753_v55 = vadd.f32 %v2832_v20, %v1752_v16 }
 0x180   :  { %v1755_v21 = vpop.f32.mrf.mxu3 }
 0x181   :  { %v1756_v24 = vadd.f32 %v2832_v20, %v1755_v21 }
 0x186   :  { %v1775_v17 = vpop.f32.mrf.mxu1 }
 0x187   :  { %v1776_v26 = vadd.f32 %v1775_v17, %v1753_v55 }
 0x18e   :  { %v1778_v23 = vpop.f32.mrf.mxu1 }
 0x18f   :  { %v1779_v27 = vadd.f32 %v1778_v23, %v1756_v24 }
 0x1c2   :  { %v1798_v19 = vpop.f32.mrf.mxu2 }
 0x1c3   :  { %v1799_v54 = vadd.f32 %v1798_v19, %v1776_v26 }
 0x1ca   :  { %v1801_v25 = vpop.f32.mrf.mxu2 }
 0x1cb   :  { %v1802_v28 = vadd.f32 %v1801_v25, %v1779_v27 }
 0x1e0   :  { %v1821_v22 = vpop.f32.mrf.mxu0 }
 0x1e1   :  { %v1822_v30 = vadd.f32 %v1821_v22, %v1799_v54 }
 0x1e8   :  { %v1824_v29 = vpop.f32.mrf.mxu0 }
 0x1e9   :  { %v1825_v31 = vadd.f32 %v1824_v29, %v1802_v28 }
 0x1eb   :  { %v2824_v32 = vpack.c.bf16 %v1825_v31, %v1822_v30 }
 0x1ed   :  { %2825 = vst [vmem:[%s3035_s5] sm:$0xff] %v2824_v32  }
 0x1ee   :  { %1835 = vsyncpa [#allocation3], 1 }
 0x1ef   :  { %1836 = vsyncpa [#allocation5], 1 }

</bundles_post_ra>
